<compile_context>
chip_gen: v6e
topology: v6e:2x2x1
jax: 0.10.0
libtpu: 0.0.40
codegen_flags: <defaults>
</compile_context>

<pallas_src>
import functools

import jax
import jax.numpy as jnp
from jax.experimental import pallas as pl
from jax.experimental.pallas import tpu as pltpu

_EPS = 1e-5


def _tpu_vmem_bytes():
    try:
        return int(pltpu.get_tpu_info().vmem_capacity_bytes)
    except Exception:
        return None


_PHYS_VMEM = _tpu_vmem_bytes()
if _PHYS_VMEM is None:
    _VMEM_LIMIT = 48 * 1024 * 1024          # safe on every generation
    _BIG_VMEM = False
else:
    # leave headroom for compiler scratch / double buffering:
    # ~48 MiB on v7x (64 MiB physical), ~96 MiB on v5e/v6e (128 MiB physical)
    _VMEM_LIMIT = min(_PHYS_VMEM * 3 // 4, 96 * 1024 * 1024)
    _BIG_VMEM = _PHYS_VMEM >= 100 * 1024 * 1024

# default matmul tiles: sweep larger on 128 MiB parts, keep modest on v7x
_MM_TM, _MM_TN, _MM_TK = (512, 1024, 1024) if _BIG_VMEM else (256, 512, 512)


def _cparams(semantics):
    return pltpu.CompilerParams(dimension_semantics=semantics,
                                vmem_limit_bytes=_VMEM_LIMIT)


def _round_up(x, m):
    return (x + m - 1) // m * m


def _pick_tile(dim, target, granule):
    """Largest multiple of `granule` <= target that divides `dim`, else `dim`."""
    if dim <= target:
        return dim
    t = target - (target % granule)
    while t >= granule:
        if dim % t == 0:
            return t
        t -= granule
    return dim


def _gelu(x):
    # TODO(synk): Whisper uses exact erf-based GELU; the tanh approximation is
    # used here because it lowers reliably in Mosaic (rel. diff ~1e-3).
    return jax.nn.gelu(x, approximate=True)


def _layernorm_rows(x, g, b):
    mu = jnp.mean(x, axis=-1, keepdims=True)
    xc = x - mu
    var = jnp.mean(xc * xc, axis=-1, keepdims=True)
    return xc * jax.lax.rsqrt(var + _EPS) * g + b


# ----------------------------------------------------------------------------
# Tiled matmul kernel: out = act(x @ w [+ bias]) [+ residual]
# (shared by the flat 2-D matmul and the batched conv matmul; bf16 MXU path,
#  f32 accumulation, bias/GELU/residual fused into the finalize step)
# ----------------------------------------------------------------------------

def _matmul_kernel(x_ref, w_ref, *rest, activation, has_bias, has_residual,
                   k_axis):
    pos = 0
    b_ref = rest[pos] if has_bias else None
    pos += int(has_bias)
    r_ref = rest[pos] if has_residual else None
    pos += int(has_residual)
    o_ref = rest[pos]
    acc_ref = rest[pos + 1]

    kk = pl.program_id(k_axis)

    @pl.when(kk == 0)
    def _():
        acc_ref[...] = jnp.zeros_like(acc_ref)

    acc_ref[...] += jnp.dot(x_ref[...].astype(jnp.bfloat16),
                            w_ref[...].astype(jnp.bfloat16),
                            preferred_element_type=jnp.float32)

    @pl.when(kk == pl.num_programs(k_axis) - 1)
    def _():
        y = acc_ref[...]
        if has_bias:
            y = y + b_ref[...].astype(jnp.float32)
        if activation == "gelu":
            y = _gelu(y)
        if has_residual:
            y = y + r_ref[...].astype(jnp.float32)
        o_ref[...] = y.astype(o_ref.dtype)


def matmul(x, w, bias=None, residual=None, activation=None,
           out_dtype=jnp.float32, tm=None, tn=None, tk=None):
    tm = _MM_TM if tm is None else tm
    tn = _MM_TN if tn is None else tn
    tk = _MM_TK if tk is None else tk
    M, K = x.shape
    N = w.shape[1]
    # pad the row axis to a tile multiple (no full-array fallback blocks)
    tm = min(tm, _round_up(M, 16))
    Mp = _round_up(M, tm)
    if Mp != M:
        x = jnp.pad(x, ((0, Mp - M), (0, 0)))
        if residual is not None:
            residual = jnp.pad(residual, ((0, Mp - M), (0, 0)))
    tn = _pick_tile(N, tn, 128)
    tk = _pick_tile(K, tk, 128)

    in_specs = [pl.BlockSpec((tm, tk), lambda i, j, k: (i, k)),
                pl.BlockSpec((tk, tn), lambda i, j, k: (k, j))]
    args = [x, w.astype(jnp.bfloat16)]
    if bias is not None:
        in_specs.append(pl.BlockSpec((1, tn), lambda i, j, k: (0, j)))
        args.append(bias.reshape(1, N))
    if residual is not None:
        in_specs.append(pl.BlockSpec((tm, tn), lambda i, j, k: (i, j)))
        args.append(residual)

    kernel = functools.partial(_matmul_kernel, activation=activation,
                               has_bias=bias is not None,
                               has_residual=residual is not None,
                               k_axis=2)
    out = pl.pallas_call(
        kernel,
        out_shape=jax.ShapeDtypeStruct((Mp, N), out_dtype),
        grid=(Mp // tm, N // tn, K // tk),
        in_specs=in_specs,
        out_specs=pl.BlockSpec((tm, tn), lambda i, j, k: (i, j)),
        scratch_shapes=[pltpu.VMEM((tm, tn), jnp.float32)],
        compiler_params=_cparams(("parallel", "parallel", "arbitrary")),
    )(*args)
    return out if Mp == M else out[:M]


# ----------------------------------------------------------------------------
# Batched conv matmul: grid (B, T-tile, N-tile, K-tile); the positional
# embedding residual is a (T, D) input whose index_map ignores the batch coord
# ----------------------------------------------------------------------------

def _conv_matmul(cols, w, bias, pos_emb=None, activation="gelu",
                 tt=256, tn=None, tk=None):
    tn = _MM_TN if tn is None else tn
    tk = _MM_TK if tk is None else tk
    B, T, KC = cols.shape
    N = w.shape[1]
    tt = _pick_tile(T, tt, 8)
    tn = _pick_tile(N, tn, 128)
    tk = _pick_tile(KC, tk, 128)

    in_specs = [pl.BlockSpec((None, tt, tk), lambda b, i, j, k: (b, i, k)),
                pl.BlockSpec((tk, tn), lambda b, i, j, k: (k, j)),
                pl.BlockSpec((1, tn), lambda b, i, j, k: (0, j))]
    args = [cols, w.astype(jnp.bfloat16), bias.reshape(1, N)]
    if pos_emb is not None:
        # batch-shared residual: index_map ignores b
        in_specs.append(pl.BlockSpec((tt, tn), lambda b, i, j, k: (i, j)))
        args.append(pos_emb)

    kernel = functools.partial(_matmul_kernel, activation=activation,
                               has_bias=True,
                               has_residual=pos_emb is not None,
                               k_axis=3)
    return pl.pallas_call(
        kernel,
        out_shape=jax.ShapeDtypeStruct((B, T, N), jnp.float32),
        grid=(B, T // tt, N // tn, KC // tk),
        in_specs=in_specs,
        out_specs=pl.BlockSpec((None, tt, tn), lambda b, i, j, k: (b, i, j)),
        scratch_shapes=[pltpu.VMEM((tt, tn), jnp.float32)],
        compiler_params=_cparams(
            ("parallel", "parallel", "parallel", "arbitrary")),
    )(*args)


def conv1d(x, w, b, stride, pos_emb=None, activation="gelu"):
    """x:[B,T,Cin], w:[K,Cin,Cout]; same-padded conv1d as im2col + tiled matmul.

    # TODO(synk): the im2col gather is done by XLA in the wrapper (K-fold input
    # reads); an in-kernel halo-block formulation would keep HBM traffic at 1x.
    """
    B, T, Cin = x.shape
    K, _, Cout = w.shape
    pad = K // 2
    xp = jnp.pad(x, ((0, 0), (pad, pad), (0, 0)))
    T_out = (T + 2 * pad - K) // stride + 1
    cols = jnp.concatenate(
        [xp[:, k:k + stride * (T_out - 1) + 1:stride, :] for k in range(K)],
        axis=-1)                                       # [B, T_out, K*Cin]
    return _conv_matmul(cols, w.reshape(K * Cin, Cout), b, pos_emb=pos_emb,
                        activation=activation)


# ----------------------------------------------------------------------------
# LayerNorm fused into its consuming matmul; LN is computed ONCE per row block
# (bf16 VMEM scratch, j innermost & "arbitrary"), not once per N tile.
# ----------------------------------------------------------------------------

def _ln_matmul_kernel(x_ref, g_ref, b_ref, w_ref, bias_ref, o_ref, xn_sc, *,
                      activation):
    @pl.when(pl.program_id(1) == 0)
    def _():
        xn = _layernorm_rows(x_ref[...].astype(jnp.float32),
                             g_ref[...].astype(jnp.float32),
                             b_ref[...].astype(jnp.float32))
        xn_sc[...] = xn.astype(xn_sc.dtype)

    y = jnp.dot(xn_sc[...], w_ref[...].astype(jnp.bfloat16),
                preferred_element_type=jnp.float32)
    y = y + bias_ref[...].astype(jnp.float32)
    if activation == "gelu":
        y = _gelu(y)
    o_ref[...] = y.astype(o_ref.dtype)


def ln_matmul(x, gamma, beta, w, bias, activation=None,
              out_dtype=jnp.float32, tm=256, tn=None):
    tn = _MM_TN if tn is None else tn
    M, K = x.shape
    N = w.shape[1]
    tm = min(tm, _round_up(M, 16))
    Mp = _round_up(M, tm)
    if Mp != M:
        x = jnp.pad(x, ((0, Mp - M), (0, 0)))
    tn = _pick_tile(N, tn, 128)
    kernel = functools.partial(_ln_matmul_kernel, activation=activation)
    out = pl.pallas_call(
        kernel,
        out_shape=jax.ShapeDtypeStruct((Mp, N), out_dtype),
        grid=(Mp // tm, N // tn),
        in_specs=[pl.BlockSpec((tm, K), lambda i, j: (i, 0)),
                  pl.BlockSpec((1, K), lambda i, j: (0, 0)),
                  pl.BlockSpec((1, K), lambda i, j: (0, 0)),
                  pl.BlockSpec((K, tn), lambda i, j: (0, j)),
                  pl.BlockSpec((1, tn), lambda i, j: (0, j))],
        out_specs=pl.BlockSpec((tm, tn), lambda i, j: (i, j)),
        scratch_shapes=[pltpu.VMEM((tm, K), jnp.bfloat16)],
        compiler_params=_cparams(("parallel", "arbitrary")),
    )(x, gamma.reshape(1, K), beta.reshape(1, K), w.astype(jnp.bfloat16),
      bias.reshape(1, N))
    return out if Mp == M else out[:M]


# ----------------------------------------------------------------------------
# LayerNorm + fused QKV projection (single kernel, three outputs, cached LN)
# ----------------------------------------------------------------------------

def _ln_qkv_kernel(x_ref, g_ref, b_ref, wq_ref, wk_ref, wv_ref, bq_ref, bv_ref,
                   q_ref, k_ref, v_ref, xn_sc):
    @pl.when(pl.program_id(1) == 0)
    def _():
        xn = _layernorm_rows(x_ref[...].astype(jnp.float32),
                             g_ref[...].astype(jnp.float32),
                             b_ref[...].astype(jnp.float32))
        xn_sc[...] = xn.astype(xn_sc.dtype)

    xn = xn_sc[...]
    q = jnp.dot(xn, wq_ref[...].astype(jnp.bfloat16),
                preferred_element_type=jnp.float32)
    q_ref[...] = (q + bq_ref[...].astype(jnp.float32)).astype(q_ref.dtype)
    # Whisper's key projection has no bias.
    k_ref[...] = jnp.dot(xn, wk_ref[...].astype(jnp.bfloat16),
                         preferred_element_type=jnp.float32).astype(k_ref.dtype)
    v = jnp.dot(xn, wv_ref[...].astype(jnp.bfloat16),
                preferred_element_type=jnp.float32)
    v_ref[...] = (v + bv_ref[...].astype(jnp.float32)).astype(v_ref.dtype)


def ln_qkv(x, gamma, beta, wq, wk, wv, bq, bv, out_dtype=jnp.bfloat16,
           tm=256, tn=None):
    tn = _MM_TN if tn is None else tn
    M, K = x.shape
    N = wq.shape[1]
    tm = min(tm, _round_up(M, 16))
    Mp = _round_up(M, tm)
    if Mp != M:
        x = jnp.pad(x, ((0, Mp - M), (0, 0)))
    tn = _pick_tile(N, tn, 128)
    bf = jnp.bfloat16
    out_sd = jax.ShapeDtypeStruct((Mp, N), out_dtype)
    out_spec = pl.BlockSpec((tm, tn), lambda i, j: (i, j))
    vec_spec = pl.BlockSpec((1, K), lambda i, j: (0, 0))
    w_spec = pl.BlockSpec((K, tn), lambda i, j: (0, j))
    b_spec = pl.BlockSpec((1, tn), lambda i, j: (0, j))
    q, k, v = pl.pallas_call(
        _ln_qkv_kernel,
        out_shape=(out_sd, out_sd, out_sd),
        grid=(Mp // tm, N // tn),
        in_specs=[pl.BlockSpec((tm, K), lambda i, j: (i, 0)),
                  vec_spec, vec_spec, w_spec, w_spec, w_spec, b_spec, b_spec],
        out_specs=(out_spec, out_spec, out_spec),
        scratch_shapes=[pltpu.VMEM((tm, K), jnp.bfloat16)],
        compiler_params=_cparams(("parallel", "arbitrary")),
    )(x, gamma.reshape(1, K), beta.reshape(1, K),
      wq.astype(bf), wk.astype(bf), wv.astype(bf),
      bq.reshape(1, N), bv.reshape(1, N))
    if Mp != M:
        q, k, v = q[:M], k[:M], v[:M]
    return q, k, v


# ----------------------------------------------------------------------------
# Flash-style attention: grid (B, q-tile, kv-tile["arbitrary"]), lane-dense
# [*, T, D] blocks, online softmax with m/l/acc scratch, per-head results
# written straight into output lane slices (no concatenate, no k.T), scale
# applied once to the cached q tile.
# ----------------------------------------------------------------------------

def _flash_attn_kernel(q_ref, k_ref, v_ref, o_ref, qs_sc, m_sc, l_sc, acc_sc,
                       *, n_heads, scale):
    j = pl.program_id(2)
    dh = q_ref.shape[-1] // n_heads

    @pl.when(j == 0)
    def _():
        qs_sc[...] = (q_ref[0].astype(jnp.float32) * scale).astype(qs_sc.dtype)
        m_sc[...] = jnp.full_like(m_sc, -jnp.inf)
        l_sc[...] = jnp.zeros_like(l_sc)
        acc_sc[...] = jnp.zeros_like(acc_sc)

    q = qs_sc[...]                                   # [tq, D] bf16, pre-scaled
    k = k_ref[0]                                     # [tkv, D]
    v = v_ref[0]                                     # [tkv, D]
    # TODO(synk): per-head dots underfill the 256-deep MXU on v6e/v7x; a
    # head-batched dot_general needs a [H, tq, dh] relayout of q/k/v.
    for h in range(n_heads):                         # static unroll over heads
        sl = slice(h * dh, (h + 1) * dh)
        # contract the head dims directly — no materialized k.T
        s = jax.lax.dot_general(q[:, sl], k[:, sl].astype(jnp.bfloat16),
                                (((1,), (1,)), ((), ())),
                                preferred_element_type=jnp.float32)  # [tq,tkv]
        m_prev = m_sc[h]                                             # [tq, 1]
        m_new = jnp.maximum(m_prev, jnp.max(s, axis=-1, keepdims=True))
        alpha = jnp.exp(m_prev - m_new)
        p = jnp.exp(s - m_new)
        l_sc[h] = alpha * l_sc[h] + jnp.sum(p, axis=-1, keepdims=True)
        pv = jnp.dot(p.astype(jnp.bfloat16), v[:, sl].astype(jnp.bfloat16),
                     preferred_element_type=jnp.float32)             # [tq, dh]
        acc_sc[h] = alpha * acc_sc[h] + pv
        m_sc[h] = m_new

    @pl.when(j == pl.num_programs(2) - 1)
    def _():
        for h in range(n_heads):
            inv = pl.reciprocal(l_sc[h], approx=True)
            o_ref[0, :, h * dh:(h + 1) * dh] = (acc_sc[h] * inv).astype(
                o_ref.dtype)


def attention(q, k, v, n_heads, tq=256, tkv=512):
    B, T, D = q.shape
    gran = 16 if q.dtype == jnp.bfloat16 else 8
    tq = _pick_tile(T, tq, gran)
    tkv = _pick_tile(T, tkv, gran)
    # TODO(synk): if T has no tile-sized divisor (e.g. Whisper T=1500) the kv
    # tile falls back to full T; masked wrapper-side padding would fix that.
    dh = D // n_heads
    scale = float(dh) ** -0.5
    kernel = functools.partial(_flash_attn_kernel, n_heads=n_heads, scale=scale)
    q_spec = pl.BlockSpec((1, tq, D), lambda b, i, j: (b, i, 0))
    kv_spec = pl.BlockSpec((1, tkv, D), lambda b, i, j: (b, j, 0))
    return pl.pallas_call(
        kernel,
        out_shape=jax.ShapeDtypeStruct((B, T, D), q.dtype),
        grid=(B, T // tq, T // tkv),
        in_specs=[q_spec, kv_spec, kv_spec],
        out_specs=pl.BlockSpec((1, tq, D), lambda b, i, j: (b, i, 0)),
        scratch_shapes=[pltpu.VMEM((tq, D), jnp.bfloat16),         # scaled q
                        pltpu.VMEM((n_heads, tq, 1), jnp.float32),  # m
                        pltpu.VMEM((n_heads, tq, 1), jnp.float32),  # l
                        pltpu.VMEM((n_heads, tq, dh), jnp.float32)],  # acc
        compiler_params=_cparams(("parallel", "parallel", "arbitrary")),
    )(q, k, v)


# ----------------------------------------------------------------------------
# Final residual add fused into ln_post
# ----------------------------------------------------------------------------

def _add_layernorm_kernel(a_ref, b_ref, g_ref, beta_ref, o_ref):
    x = a_ref[...].astype(jnp.float32) + b_ref[...].astype(jnp.float32)
    y = _layernorm_rows(x, g_ref[...].astype(jnp.float32),
                        beta_ref[...].astype(jnp.float32))
    o_ref[...] = y.astype(o_ref.dtype)


def add_layernorm(a, b, gamma, beta, tm=256):
    M, C = a.shape
    tm = min(tm, _round_up(M, 8))
    Mp = _round_up(M, tm)
    if Mp != M:
        a = jnp.pad(a, ((0, Mp - M), (0, 0)))
        b = jnp.pad(b, ((0, Mp - M), (0, 0)))
    row_spec = pl.BlockSpec((tm, C), lambda i: (i, 0))
    vec_spec = pl.BlockSpec((1, C), lambda i: (0, 0))
    out = pl.pallas_call(
        _add_layernorm_kernel,
        out_shape=jax.ShapeDtypeStruct((Mp, C), jnp.float32),
        grid=(Mp // tm,),
        in_specs=[row_spec, row_spec, vec_spec, vec_spec],
        out_specs=row_spec,
        compiler_params=_cparams(("parallel",)),
    )(a, b, gamma.reshape(1, C), beta.reshape(1, C))
    return out if Mp == M else out[:M]


def sinusoids(length, channels, max_timescale=10000.0):
    inc = jnp.log(max_timescale) / (channels // 2 - 1)
    inv = jnp.exp(-inc * jnp.arange(channels // 2, dtype=jnp.float32))
    t = jnp.arange(length, dtype=jnp.float32)[:, None] * inv[None, :]
    return jnp.concatenate([jnp.sin(t), jnp.cos(t)], axis=1)


# ----------------------------------------------------------------------------
# Forward pass (substitution-hook semantics of WhisperSubbedActivation)
# ----------------------------------------------------------------------------

def whisper_subbed_forward(params, mels, substitute_activation, *, n_heads,
                           substitution_layer="encoder.blocks.0.mlp"):
    B = mels.shape[0]
    blk = params["block0"]
    attn_p, mlp_p = blk["attn"], blk["mlp"]
    D = params["conv2_w"].shape[-1]

    # ---- encoder stem -------------------------------------------------------
    x = conv1d(mels, params["conv1_w"], params["conv1_b"], stride=1)
    T = (x.shape[1] + 2 * 1 - 3) // 2 + 1               # conv2 output length
    pos = params["pos_emb"][:T, :].astype(jnp.float32)  # (T, D), batch-shared
    # gelu(conv2) + positional embedding, fused in the matmul finalize
    x = conv1d(x, params["conv2_w"], params["conv2_b"], stride=2,
               pos_emb=pos)                              # [B, T, D] f32
    xf = x.reshape(B * T, D)

    # ---- block 0: attention sub-layer (ln1 fused into the QKV projection) ---
    q, k, v = ln_qkv(xf, blk["ln1_g"], blk["ln1_b"],
                     attn_p["wq"], attn_p["wk"], attn_p["wv"],
                     attn_p["bq"], attn_p["bv"], out_dtype=jnp.bfloat16)
    o = attention(q.reshape(B, T, D), k.reshape(B, T, D), v.reshape(B, T, D),
                  n_heads)
    # output projection with the residual add fused into the finalize
    x1 = matmul(o.reshape(B * T, D), attn_p["wo"], bias=attn_p["bo"],
                residual=xf, out_dtype=jnp.float32)

    # ---- block 0: MLP sub-layer (hookable: "encoder.blocks.0.mlp") ----------
    if (substitute_activation is not None
            and substitution_layer == "encoder.blocks.0.mlp"):
        # forward hook: return substitute_activation.to(output.dtype)
        # (the MLP itself becomes dead work, so it is skipped entirely)
        mlp_out = substitute_activation.astype(x1.dtype).reshape(B * T, D)
    else:
        h = ln_matmul(x1, blk["ln2_g"], blk["ln2_b"], mlp_p["w1"], mlp_p["b1"],
                      activation="gelu", out_dtype=jnp.bfloat16)
        mlp_out = matmul(h, mlp_p["w2"], bias=mlp_p["b2"],
                         out_dtype=jnp.float32)

    # ---- final layernorm (encoder.ln_post) with the residual add fused ------
    out = add_layernorm(x1, mlp_out, params["lnp_g"], params["lnp_b"])
    return out.reshape(B, T, D)


# ----------------------------------------------------------------------------
# Pure-JAX f32 reference (same math) for a tolerance check
# ----------------------------------------------------------------------------

def reference_forward(params, mels, substitute_activation, n_heads):
    def ln(x, g, b):
        mu = x.mean(-1, keepdims=True)
        var = ((x - mu) ** 2).mean(-1, keepdims=True)
        return (x - mu) * jax.lax.rsqrt(var + _EPS) * g + b

    def conv(x, w, b, stride):
        B, T, Cin = x.shape
        K, _, Cout = w.shape
        pad = K // 2
        xp = jnp.pad(x, ((0, 0), (pad, pad), (0, 0)))
        T_out = (T + 2 * pad - K) // stride + 1
        cols = jnp.concatenate(
            [xp[:, k:k + stride * (T_out - 1) + 1:stride, :] for k in range(K)],
            axis=-1)
        y = cols.reshape(B * T_out, K * Cin) @ w.reshape(K * Cin, Cout) + b
        return jax.nn.gelu(y, approximate=True).reshape(B, T_out, Cout)

    blk = params["block0"]
    ap, mp = blk["attn"], blk["mlp"]
    B = mels.shape[0]
    x = conv(mels, params["conv1_w"], params["conv1_b"], 1)
    x = conv(x, params["conv2_w"], params["conv2_b"], 2)
    _, T, D = x.shape
    x = x + params["pos_emb"][None, :T, :]
    xn = ln(x, blk["ln1_g"], blk["ln1_b"])
    q = xn @ ap["wq"] + ap["bq"]
    k = xn @ ap["wk"]
    v = xn @ ap["wv"] + ap["bv"]
    dh = D // n_heads

    def split(t):
        return t.reshape(B, T, n_heads, dh).transpose(0, 2, 1, 3)

    s = jnp.einsum("bhqd,bhkd->bhqk", split(q) * dh ** -0.5, split(k))
    p = jax.nn.softmax(s, axis=-1)
    o = jnp.einsum("bhqk,bhkd->bhqd", p, split(v))
    o = o.transpose(0, 2, 1, 3).reshape(B, T, D)
    x1 = x + o @ ap["wo"] + ap["bo"]
    if substitute_activation is not None:
        m = substitute_activation.astype(x1.dtype)
    else:
        h = jax.nn.gelu(ln(x1, blk["ln2_g"], blk["ln2_b"]) @ mp["w1"] + mp["b1"],
                        approximate=True)
        m = h @ mp["w2"] + mp["b2"]
    return ln(x1 + m, params["lnp_g"], params["lnp_b"])


# ----------------------------------------------------------------------------
# Deterministic parameter initialization
# ----------------------------------------------------------------------------

def init_params(key, n_mels, d_model, mlp_mult, max_t):
    ks = iter(jax.random.split(key, 16))
    s = 0.02

    def nrm(shape):
        return (s * jax.random.normal(next(ks), shape)).astype(jnp.float32)

    D, H = d_model, mlp_mult * d_model
    return {
        "conv1_w": nrm((3, n_mels, D)), "conv1_b": nrm((D,)),
        "conv2_w": nrm((3, D, D)), "conv2_b": nrm((D,)),
        "pos_emb": sinusoids(max_t, D),
        "block0": {
            "ln1_g": jnp.ones((D,), jnp.float32),
            "ln1_b": jnp.zeros((D,), jnp.float32),
            "ln2_g": jnp.ones((D,), jnp.float32),
            "ln2_b": jnp.zeros((D,), jnp.float32),
            "attn": {
                "wq": nrm((D, D)), "bq": nrm((D,)),
                "wk": nrm((D, D)),
                "wv": nrm((D, D)), "bv": nrm((D,)),
                "wo": nrm((D, D)), "bo": nrm((D,)),
            },
            "mlp": {
                "w1": nrm((D, H)), "b1": nrm((H,)),
                "w2": nrm((H, D)), "b2": nrm((D,)),
            },
        },
        "lnp_g": jnp.ones((D,), jnp.float32),
        "lnp_b": jnp.zeros((D,), jnp.float32),
    }


# ----------------------------------------------------------------------------
# Main
# ----------------------------------------------------------------------------

if __name__ == "__main__":
    B, SEQ, N_MELS = 2, 16, 8
    D_MODEL, N_HEADS, MLP_MULT = 32, 4, 4
    T_OUT = SEQ // 2  # after the stride-2 conv2

    root = jax.random.PRNGKey(0)
    k_param, k_mel, k_sub = jax.random.split(root, 3)

    params = init_params(k_param, N_MELS, D_MODEL, MLP_MULT, max_t=T_OUT)
    mels = jax.random.normal(k_mel, (B, SEQ, N_MELS), dtype=jnp.float32)
    substitute_activation = jax.random.normal(
        k_sub, (B, T_OUT, D_MODEL), dtype=jnp.float32)

    fwd = jax.jit(whisper_subbed_forward,
                  static_argnames=("n_heads", "substitution_layer"))

    # With substitution (the hooked path — MLP skipped, output replaced).
    out_sub = fwd(params, mels, substitute_activation, n_heads=N_HEADS)
    jax.block_until_ready(out_sub)

    # Without substitution (hook not registered) — exercises the MLP kernels.
    out_plain = fwd(params, mels, None, n_heads=N_HEADS)
    jax.block_until_ready(out_plain)

    assert out_sub.shape == (B, T_OUT, D_MODEL)
    assert out_plain.shape == (B, T_OUT, D_MODEL)

    ref_sub = reference_forward(params, mels, substitute_activation, N_HEADS)
    ref_plain = reference_forward(params, mels, None, N_HEADS)
    assert bool(jnp.allclose(out_sub, ref_sub, rtol=3e-2, atol=3e-2))
    assert bool(jnp.allclose(out_plain, ref_plain, rtol=3e-2, atol=3e-2))

    print("KERNEL_OK")
</pallas_src>

<mosaic_0001>
module attributes {stable_mosaic.version = 11 : i64} {
  func.func @_matmul_kernel(%arg0: i32, %arg1: i32, %arg2: i32, %arg3: i32, %arg4: memref<1x8x96xf32, #tpu.memory_space<vmem>>, %arg5: memref<96x32xbf16, #tpu.memory_space<vmem>>, %arg6: memref<1x32xf32, #tpu.memory_space<vmem>>, %arg7: memref<8x32xf32, #tpu.memory_space<vmem>>, %arg8: memref<1x8x32xf32, #tpu.memory_space<vmem>>, %arg9: memref<8x32xf32, #tpu.memory_space<vmem>>) attributes {dimension_semantics = [#tpu.dimension_semantics<parallel>, #tpu.dimension_semantics<parallel>, #tpu.dimension_semantics<parallel>, #tpu.dimension_semantics<arbitrary>], iteration_bounds = array<i64: 2, 1, 1, 1>, scalar_prefetch = 0 : i64, scratch_operands = 1 : i64, tpu.core_type = #tpu.core_type<tc>, window_params = [{transform_indices = @transform_0, window_bounds = array<i64: 1, 8, 96>}, {transform_indices = @transform_1, window_bounds = array<i64: 96, 32>}, {transform_indices = @transform_2, window_bounds = array<i64: 1, 32>}, {transform_indices = @transform_3, window_bounds = array<i64: 8, 32>}, {transform_indices = @transform_4, window_bounds = array<i64: 1, 8, 32>}]} {
    %c0_i32 = arith.constant 0 : i32
    %0 = arith.cmpi eq, %arg3, %c0_i32 : i32
    %1 = arith.extui %0 : i1 to i32
    %c0_i32_0 = arith.constant 0 : i32
    %2 = arith.cmpi ne, %1, %c0_i32_0 : i32
    scf.if %2 {
      %cst_11 = arith.constant 0.000000e+00 : f32
      %14 = vector.broadcast %cst_11 : f32 to vector<8x32xf32>
      %c0_12 = arith.constant 0 : index
      %c0_13 = arith.constant 0 : index
      %15 = vector.load %arg9[%c0_12, %c0_13] : memref<8x32xf32, #tpu.memory_space<vmem>>, vector<8x32xf32>
      tpu.vector_store %arg9[%c0_12, %c0_13], %14 {strides = array<i32>} : memref<8x32xf32, #tpu.memory_space<vmem>>, vector<8x32xf32>,
    } else {
    }
    %c0 = arith.constant 0 : index
    %c0_1 = arith.constant 0 : index
    %3 = vector.load %arg9[%c0, %c0_1] : memref<8x32xf32, #tpu.memory_space<vmem>>, vector<8x32xf32>
    %c0_2 = arith.constant 0 : index
    %c0_3 = arith.constant 0 : index
    %c0_4 = arith.constant 0 : index
    %4 = vector.load %arg4[%c0_2, %c0_3, %c0_4] : memref<1x8x96xf32, #tpu.memory_space<vmem>>, vector<1x8x96xf32>
    %5 = vector.shape_cast %4 : vector<1x8x96xf32> to vector<8x96xf32>
    %6 = arith.truncf %5 : vector<8x96xf32> to vector<8x96xbf16>
    %c0_5 = arith.constant 0 : index
    %c0_6 = arith.constant 0 : index
    %7 = vector.load %arg5[%c0_5, %c0_6] : memref<96x32xbf16, #tpu.memory_space<vmem>>, vector<96x32xbf16>
    %cst = arith.constant dense<0.000000e+00> : vector<8x32xf32>
    %8 = tpu.matmul %6, %7, %cst {dimension_numbers = #tpu.dot_dimension_numbers<[1], [0], [0], [1], [0, 0, 1, 1], [], []>} : vector<8x96xbf16>, vector<96x32xbf16>, vector<8x32xf32> -> vector<8x32xf32>
    %9 = arith.addf %3, %8 : vector<8x32xf32>
    %c0_7 = arith.constant 0 : index
    %c0_8 = arith.constant 0 : index
    %10 = vector.load %arg9[%c0_7, %c0_8] : memref<8x32xf32, #tpu.memory_space<vmem>>, vector<8x32xf32>
    tpu.vector_store %arg9[%c0_7, %c0_8], %9 {strides = array<i32>} : memref<8x32xf32, #tpu.memory_space<vmem>>, vector<8x32xf32>,
    %c0_i32_9 = arith.constant 0 : i32
    %11 = arith.cmpi eq, %arg3, %c0_i32_9 : i32
    %12 = arith.extui %11 : i1 to i32
    %c0_i32_10 = arith.constant 0 : i32
    %13 = arith.cmpi ne, %12, %c0_i32_10 : i32
    scf.if %13 {
      %c0_11 = arith.constant 0 : index
      %c0_12 = arith.constant 0 : index
      %14 = vector.load %arg9[%c0_11, %c0_12] : memref<8x32xf32, #tpu.memory_space<vmem>>, vector<8x32xf32>
      %c0_13 = arith.constant 0 : index
      %c0_14 = arith.constant 0 : index
      %15 = vector.load %arg6[%c0_13, %c0_14] : memref<1x32xf32, #tpu.memory_space<vmem>>, vector<1x32xf32>
      %16 = vector.broadcast %15 : vector<1x32xf32> to vector<8x32xf32>
      %17 = arith.addf %14, %16 : vector<8x32xf32>
      %18 = arith.mulf %17, %17 : vector<8x32xf32>
      %19 = arith.mulf %17, %18 : vector<8x32xf32>
      %cst_15 = arith.constant 4.471500e-02 : f32
      %20 = vector.broadcast %cst_15 : f32 to vector<8x32xf32>
      %21 = arith.mulf %20, %19 : vector<8x32xf32>
      %22 = arith.addf %17, %21 : vector<8x32xf32>
      %cst_16 = arith.constant 0.797884583 : f32
      %23 = vector.broadcast %cst_16 : f32 to vector<8x32xf32>
      %24 = arith.mulf %23, %22 : vector<8x32xf32>
      %25 = math.tanh %24 : vector<8x32xf32>
      %cst_17 = arith.constant 1.000000e+00 : f32
      %26 = vector.broadcast %cst_17 : f32 to vector<8x32xf32>
      %27 = arith.addf %26, %25 : vector<8x32xf32>
      %cst_18 = arith.constant 5.000000e-01 : f32
      %28 = vector.broadcast %cst_18 : f32 to vector<8x32xf32>
      %29 = arith.mulf %28, %27 : vector<8x32xf32>
      %30 = arith.mulf %17, %29 : vector<8x32xf32>
      %c0_19 = arith.constant 0 : index
      %c0_20 = arith.constant 0 : index
      %31 = vector.load %arg7[%c0_19, %c0_20] : memref<8x32xf32, #tpu.memory_space<vmem>>, vector<8x32xf32>
      %32 = arith.addf %30, %31 : vector<8x32xf32>
      %c0_21 = arith.constant 0 : index
      %c0_22 = arith.constant 0 : index
      %c0_23 = arith.constant 0 : index
      %33 = vector.load %arg8[%c0_21, %c0_22, %c0_23] : memref<1x8x32xf32, #tpu.memory_space<vmem>>, vector<1x8x32xf32>
      %34 = vector.shape_cast %33 : vector<1x8x32xf32> to vector<8x32xf32>
      %35 = vector.shape_cast %32 : vector<8x32xf32> to vector<1x8x32xf32>
      tpu.vector_store %arg8[%c0_21, %c0_22, %c0_23], %35 {strides = array<i32>} : memref<1x8x32xf32, #tpu.memory_space<vmem>>, vector<1x8x32xf32>,
    } else {
    }
    return
  }
  func.func @transform_0(%arg0: i32, %arg1: i32, %arg2: i32, %arg3: i32) -> (i32, i32, i32) {
    %c0_i32 = arith.constant 0 : i32
    return %arg0, %arg1, %arg3 : i32, i32, i32
  }
  func.func @transform_1(%arg0: i32, %arg1: i32, %arg2: i32, %arg3: i32) -> (i32, i32) {
    %c0_i32 = arith.constant 0 : i32
    return %arg3, %arg2 : i32, i32
  }
  func.func @transform_2(%arg0: i32, %arg1: i32, %arg2: i32, %arg3: i32) -> (i32, i32) {
    %c0_i32 = arith.constant 0 : i32
    %c0_i32_0 = arith.constant 0 : i32
    return %c0_i32, %arg2 : i32, i32
  }
  func.func @transform_3(%arg0: i32, %arg1: i32, %arg2: i32, %arg3: i32) -> (i32, i32) {
    %c0_i32 = arith.constant 0 : i32
    return %arg1, %arg2 : i32, i32
  }
  func.func @transform_4(%arg0: i32, %arg1: i32, %arg2: i32, %arg3: i32) -> (i32, i32, i32) {
    %c0_i32 = arith.constant 0 : i32
    return %arg0, %arg1, %arg2 : i32, i32, i32
  }
}

module attributes {stable_mosaic.version = 11 : i64} {
  func.func @_matmul_kernel(%arg0: i32, %arg1: i32, %arg2: i32, %arg3: i32, %arg4: memref<1x16x24xf32, #tpu.memory_space<vmem>>, %arg5: memref<24x32xbf16, #tpu.memory_space<vmem>>, %arg6: memref<1x32xf32, #tpu.memory_space<vmem>>, %arg7: memref<1x16x32xf32, #tpu.memory_space<vmem>>, %arg8: memref<16x32xf32, #tpu.memory_space<vmem>>) attributes {dimension_semantics = [#tpu.dimension_semantics<parallel>, #tpu.dimension_semantics<parallel>, #tpu.dimension_semantics<parallel>, #tpu.dimension_semantics<arbitrary>], iteration_bounds = array<i64: 2, 1, 1, 1>, scalar_prefetch = 0 : i64, scratch_operands = 1 : i64, tpu.core_type = #tpu.core_type<tc>, window_params = [{transform_indices = @transform_0, window_bounds = array<i64: 1, 16, 24>}, {transform_indices = @transform_1, window_bounds = array<i64: 24, 32>}, {transform_indices = @transform_2, window_bounds = array<i64: 1, 32>}, {transform_indices = @transform_3, window_bounds = array<i64: 1, 16, 32>}]} {
    %c0_i32 = arith.constant 0 : i32
    %0 = arith.cmpi eq, %arg3, %c0_i32 : i32
    %1 = arith.extui %0 : i1 to i32
    %c0_i32_0 = arith.constant 0 : i32
    %2 = arith.cmpi ne, %1, %c0_i32_0 : i32
    scf.if %2 {
      %cst_11 = arith.constant 0.000000e+00 : f32
      %14 = vector.broadcast %cst_11 : f32 to vector<16x32xf32>
      %c0_12 = arith.constant 0 : index
      %c0_13 = arith.constant 0 : index
      %15 = vector.load %arg8[%c0_12, %c0_13] : memref<16x32xf32, #tpu.memory_space<vmem>>, vector<16x32xf32>
      tpu.vector_store %arg8[%c0_12, %c0_13], %14 {strides = array<i32>} : memref<16x32xf32, #tpu.memory_space<vmem>>, vector<16x32xf32>,
    } else {
    }
    %c0 = arith.constant 0 : index
    %c0_1 = arith.constant 0 : index
    %3 = vector.load %arg8[%c0, %c0_1] : memref<16x32xf32, #tpu.memory_space<vmem>>, vector<16x32xf32>
    %c0_2 = arith.constant 0 : index
    %c0_3 = arith.constant 0 : index
    %c0_4 = arith.constant 0 : index
    %4 = vector.load %arg4[%c0_2, %c0_3, %c0_4] : memref<1x16x24xf32, #tpu.memory_space<vmem>>, vector<1x16x24xf32>
    %5 = vector.shape_cast %4 : vector<1x16x24xf32> to vector<16x24xf32>
    %6 = arith.truncf %5 : vector<16x24xf32> to vector<16x24xbf16>
    %c0_5 = arith.constant 0 : index
    %c0_6 = arith.constant 0 : index
    %7 = vector.load %arg5[%c0_5, %c0_6] : memref<24x32xbf16, #tpu.memory_space<vmem>>, vector<24x32xbf16>
    %cst = arith.constant dense<0.000000e+00> : vector<16x32xf32>
    %8 = tpu.matmul %6, %7, %cst {dimension_numbers = #tpu.dot_dimension_numbers<[1], [0], [0], [1], [0, 0, 1, 1], [], []>} : vector<16x24xbf16>, vector<24x32xbf16>, vector<16x32xf32> -> vector<16x32xf32>
    %9 = arith.addf %3, %8 : vector<16x32xf32>
    %c0_7 = arith.constant 0 : index
    %c0_8 = arith.constant 0 : index
    %10 = vector.load %arg8[%c0_7, %c0_8] : memref<16x32xf32, #tpu.memory_space<vmem>>, vector<16x32xf32>
    tpu.vector_store %arg8[%c0_7, %c0_8], %9 {strides = array<i32>} : memref<16x32xf32, #tpu.memory_space<vmem>>, vector<16x32xf32>,
    %c0_i32_9 = arith.constant 0 : i32
    %11 = arith.cmpi eq, %arg3, %c0_i32_9 : i32
    %12 = arith.extui %11 : i1 to i32
    %c0_i32_10 = arith.constant 0 : i32
    %13 = arith.cmpi ne, %12, %c0_i32_10 : i32
    scf.if %13 {
      %c0_11 = arith.constant 0 : index
      %c0_12 = arith.constant 0 : index
      %14 = vector.load %arg8[%c0_11, %c0_12] : memref<16x32xf32, #tpu.memory_space<vmem>>, vector<16x32xf32>
      %c0_13 = arith.constant 0 : index
      %c0_14 = arith.constant 0 : index
      %15 = vector.load %arg6[%c0_13, %c0_14] : memref<1x32xf32, #tpu.memory_space<vmem>>, vector<1x32xf32>
      %16 = vector.broadcast %15 : vector<1x32xf32> to vector<16x32xf32>
      %17 = arith.addf %14, %16 : vector<16x32xf32>
      %18 = arith.mulf %17, %17 : vector<16x32xf32>
      %19 = arith.mulf %17, %18 : vector<16x32xf32>
      %cst_15 = arith.constant 4.471500e-02 : f32
      %20 = vector.broadcast %cst_15 : f32 to vector<16x32xf32>
      %21 = arith.mulf %20, %19 : vector<16x32xf32>
      %22 = arith.addf %17, %21 : vector<16x32xf32>
      %cst_16 = arith.constant 0.797884583 : f32
      %23 = vector.broadcast %cst_16 : f32 to vector<16x32xf32>
      %24 = arith.mulf %23, %22 : vector<16x32xf32>
      %25 = math.tanh %24 : vector<16x32xf32>
      %cst_17 = arith.constant 1.000000e+00 : f32
      %26 = vector.broadcast %cst_17 : f32 to vector<16x32xf32>
      %27 = arith.addf %26, %25 : vector<16x32xf32>
      %cst_18 = arith.constant 5.000000e-01 : f32
      %28 = vector.broadcast %cst_18 : f32 to vector<16x32xf32>
      %29 = arith.mulf %28, %27 : vector<16x32xf32>
      %30 = arith.mulf %17, %29 : vector<16x32xf32>
      %c0_19 = arith.constant 0 : index
      %c0_20 = arith.constant 0 : index
      %c0_21 = arith.constant 0 : index
      %31 = vector.load %arg7[%c0_19, %c0_20, %c0_21] : memref<1x16x32xf32, #tpu.memory_space<vmem>>, vector<1x16x32xf32>
      %32 = vector.shape_cast %31 : vector<1x16x32xf32> to vector<16x32xf32>
      %33 = vector.shape_cast %30 : vector<16x32xf32> to vector<1x16x32xf32>
      tpu.vector_store %arg7[%c0_19, %c0_20, %c0_21], %33 {strides = array<i32>} : memref<1x16x32xf32, #tpu.memory_space<vmem>>, vector<1x16x32xf32>,
    } else {
    }
    return
  }
  func.func @transform_0(%arg0: i32, %arg1: i32, %arg2: i32, %arg3: i32) -> (i32, i32, i32) {
    %c0_i32 = arith.constant 0 : i32
    return %arg0, %arg1, %arg3 : i32, i32, i32
  }
  func.func @transform_1(%arg0: i32, %arg1: i32, %arg2: i32, %arg3: i32) -> (i32, i32) {
    %c0_i32 = arith.constant 0 : i32
    return %arg3, %arg2 : i32, i32
  }
  func.func @transform_2(%arg0: i32, %arg1: i32, %arg2: i32, %arg3: i32) -> (i32, i32) {
    %c0_i32 = arith.constant 0 : i32
    %c0_i32_0 = arith.constant 0 : i32
    return %c0_i32, %arg2 : i32, i32
  }
  func.func @transform_3(%arg0: i32, %arg1: i32, %arg2: i32, %arg3: i32) -> (i32, i32, i32) {
    %c0_i32 = arith.constant 0 : i32
    return %arg0, %arg1, %arg2 : i32, i32, i32
  }
}

module attributes {stable_mosaic.version = 11 : i64} {
  func.func @_ln_qkv_kernel(%arg0: i32, %arg1: i32, %arg2: memref<16x32xf32, #tpu.memory_space<vmem>>, %arg3: memref<1x32xf32, #tpu.memory_space<vmem>>, %arg4: memref<1x32xf32, #tpu.memory_space<vmem>>, %arg5: memref<32x32xbf16, #tpu.memory_space<vmem>>, %arg6: memref<32x32xbf16, #tpu.memory_space<vmem>>, %arg7: memref<32x32xbf16, #tpu.memory_space<vmem>>, %arg8: memref<1x32xf32, #tpu.memory_space<vmem>>, %arg9: memref<1x32xf32, #tpu.memory_space<vmem>>, %arg10: memref<16x32xbf16, #tpu.memory_space<vmem>>, %arg11: memref<16x32xbf16, #tpu.memory_space<vmem>>, %arg12: memref<16x32xbf16, #tpu.memory_space<vmem>>, %arg13: memref<16x32xbf16, #tpu.memory_space<vmem>>) attributes {dimension_semantics = [#tpu.dimension_semantics<parallel>, #tpu.dimension_semantics<arbitrary>], iteration_bounds = array<i64: 1, 1>, scalar_prefetch = 0 : i64, scratch_operands = 1 : i64, tpu.core_type = #tpu.core_type<tc>, window_params = [{transform_indices = @transform_0, window_bounds = array<i64: 16, 32>}, {pipeline_mode = #tpu.pipeline_mode<synchronous>, transform_indices = @transform_1, window_bounds = array<i64: 1, 32>}, {pipeline_mode = #tpu.pipeline_mode<synchronous>, transform_indices = @transform_2, window_bounds = array<i64: 1, 32>}, {transform_indices = @transform_3, window_bounds = array<i64: 32, 32>}, {transform_indices = @transform_4, window_bounds = array<i64: 32, 32>}, {transform_indices = @transform_5, window_bounds = array<i64: 32, 32>}, {transform_indices = @transform_6, window_bounds = array<i64: 1, 32>}, {transform_indices = @transform_7, window_bounds = array<i64: 1, 32>}, {transform_indices = @transform_8, window_bounds = array<i64: 16, 32>}, {transform_indices = @transform_9, window_bounds = array<i64: 16, 32>}, {transform_indices = @transform_10, window_bounds = array<i64: 16, 32>}]} {
    %c0_i32 = arith.constant 0 : i32
    %0 = arith.cmpi eq, %arg1, %c0_i32 : i32
    %1 = arith.extui %0 : i1 to i32
    %c0_i32_0 = arith.constant 0 : i32
    %2 = arith.cmpi ne, %1, %c0_i32_0 : i32
    scf.if %2 {
      %c0_20 = arith.constant 0 : index
      %c0_21 = arith.constant 0 : index
      %22 = vector.load %arg2[%c0_20, %c0_21] : memref<16x32xf32, #tpu.memory_space<vmem>>, vector<16x32xf32>
      %c0_22 = arith.constant 0 : index
      %c0_23 = arith.constant 0 : index
      %23 = vector.load %arg3[%c0_22, %c0_23] : memref<1x32xf32, #tpu.memory_space<vmem>>, vector<1x32xf32>
      %c0_24 = arith.constant 0 : index
      %c0_25 = arith.constant 0 : index
      %24 = vector.load %arg4[%c0_24, %c0_25] : memref<1x32xf32, #tpu.memory_space<vmem>>, vector<1x32xf32>
      %cst_26 = arith.constant dense<0.000000e+00> : vector<16xf32>
      %25 = vector.multi_reduction <add>, %22, %cst_26 [1] : vector<16x32xf32> to vector<16xf32>
      %26 = vector.shape_cast %25 : vector<16xf32> to vector<16x1xf32>
      %cst_27 = arith.constant 3.200000e+01 : f32
      %27 = vector.broadcast %cst_27 : f32 to vector<16x1xf32>
      %28 = arith.divf %26, %27 : vector<16x1xf32>
      %29 = vector.broadcast %28 : vector<16x1xf32> to vector<16x32xf32>
      %30 = arith.subf %22, %29 : vector<16x32xf32>
      %31 = arith.mulf %30, %30 : vector<16x32xf32>
      %cst_28 = arith.constant dense<0.000000e+00> : vector<16xf32>
      %32 = vector.multi_reduction <add>, %31, %cst_28 [1] : vector<16x32xf32> to vector<16xf32>
      %33 = vector.shape_cast %32 : vector<16xf32> to vector<16x1xf32>
      %cst_29 = arith.constant 3.200000e+01 : f32
      %34 = vector.broadcast %cst_29 : f32 to vector<16x1xf32>
      %35 = arith.divf %33, %34 : vector<16x1xf32>
      %cst_30 = arith.constant 9.99999974E-6 : f32
      %36 = vector.broadcast %cst_30 : f32 to vector<16x1xf32>
      %37 = arith.addf %35, %36 : vector<16x1xf32>
      %38 = math.rsqrt %37 : vector<16x1xf32>
      %39 = vector.broadcast %38 : vector<16x1xf32> to vector<16x32xf32>
      %40 = arith.mulf %30, %39 : vector<16x32xf32>
      %41 = vector.broadcast %23 : vector<1x32xf32> to vector<16x32xf32>
      %42 = arith.mulf %40, %41 : vector<16x32xf32>
      %43 = vector.broadcast %24 : vector<1x32xf32> to vector<16x32xf32>
      %44 = arith.addf %42, %43 : vector<16x32xf32>
      %45 = arith.truncf %44 : vector<16x32xf32> to vector<16x32xbf16>
      %c0_31 = arith.constant 0 : index
      %c0_32 = arith.constant 0 : index
      %46 = vector.load %arg13[%c0_31, %c0_32] : memref<16x32xbf16, #tpu.memory_space<vmem>>, vector<16x32xbf16>
      tpu.vector_store %arg13[%c0_31, %c0_32], %45 {strides = array<i32>} : memref<16x32xbf16, #tpu.memory_space<vmem>>, vector<16x32xbf16>,
    } else {
    }
    %c0 = arith.constant 0 : index
    %c0_1 = arith.constant 0 : index
    %3 = vector.load %arg13[%c0, %c0_1] : memref<16x32xbf16, #tpu.memory_space<vmem>>, vector<16x32xbf16>
    %c0_2 = arith.constant 0 : index
    %c0_3 = arith.constant 0 : index
    %4 = vector.load %arg5[%c0_2, %c0_3] : memref<32x32xbf16, #tpu.memory_space<vmem>>, vector<32x32xbf16>
    %cst = arith.constant dense<0.000000e+00> : vector<16x32xf32>
    %5 = tpu.matmul %3, %4, %cst {dimension_numbers = #tpu.dot_dimension_numbers<[1], [0], [0], [1], [0, 0, 1, 1], [], []>} : vector<16x32xbf16>, vector<32x32xbf16>, vector<16x32xf32> -> vector<16x32xf32>
    %c0_4 = arith.constant 0 : index
    %c0_5 = arith.constant 0 : index
    %6 = vector.load %arg8[%c0_4, %c0_5] : memref<1x32xf32, #tpu.memory_space<vmem>>, vector<1x32xf32>
    %7 = vector.broadcast %6 : vector<1x32xf32> to vector<16x32xf32>
    %8 = arith.addf %5, %7 : vector<16x32xf32>
    %9 = arith.truncf %8 : vector<16x32xf32> to vector<16x32xbf16>
    %c0_6 = arith.constant 0 : index
    %c0_7 = arith.constant 0 : index
    %10 = vector.load %arg10[%c0_6, %c0_7] : memref<16x32xbf16, #tpu.memory_space<vmem>>, vector<16x32xbf16>
    tpu.vector_store %arg10[%c0_6, %c0_7], %9 {strides = array<i32>} : memref<16x32xbf16, #tpu.memory_space<vmem>>, vector<16x32xbf16>,
    %c0_8 = arith.constant 0 : index
    %c0_9 = arith.constant 0 : index
    %11 = vector.load %arg6[%c0_8, %c0_9] : memref<32x32xbf16, #tpu.memory_space<vmem>>, vector<32x32xbf16>
    %cst_10 = arith.constant dense<0.000000e+00> : vector<16x32xf32>
    %12 = tpu.matmul %3, %11, %cst_10 {dimension_numbers = #tpu.dot_dimension_numbers<[1], [0], [0], [1], [0, 0, 1, 1], [], []>} : vector<16x32xbf16>, vector<32x32xbf16>, vector<16x32xf32> -> vector<16x32xf32>
    %13 = arith.truncf %12 : vector<16x32xf32> to vector<16x32xbf16>
    %c0_11 = arith.constant 0 : index
    %c0_12 = arith.constant 0 : index
    %14 = vector.load %arg11[%c0_11, %c0_12] : memref<16x32xbf16, #tpu.memory_space<vmem>>, vector<16x32xbf16>
    tpu.vector_store %arg11[%c0_11, %c0_12], %13 {strides = array<i32>} : memref<16x32xbf16, #tpu.memory_space<vmem>>, vector<16x32xbf16>,
    %c0_13 = arith.constant 0 : index
    %c0_14 = arith.constant 0 : index
    %15 = vector.load %arg7[%c0_13, %c0_14] : memref<32x32xbf16, #tpu.memory_space<vmem>>, vector<32x32xbf16>
    %cst_15 = arith.constant dense<0.000000e+00> : vector<16x32xf32>
    %16 = tpu.matmul %3, %15, %cst_15 {dimension_numbers = #tpu.dot_dimension_numbers<[1], [0], [0], [1], [0, 0, 1, 1], [], []>} : vector<16x32xbf16>, vector<32x32xbf16>, vector<16x32xf32> -> vector<16x32xf32>
    %c0_16 = arith.constant 0 : index
    %c0_17 = arith.constant 0 : index
    %17 = vector.load %arg9[%c0_16, %c0_17] : memref<1x32xf32, #tpu.memory_space<vmem>>, vector<1x32xf32>
    %18 = vector.broadcast %17 : vector<1x32xf32> to vector<16x32xf32>
    %19 = arith.addf %16, %18 : vector<16x32xf32>
    %20 = arith.truncf %19 : vector<16x32xf32> to vector<16x32xbf16>
    %c0_18 = arith.constant 0 : index
    %c0_19 = arith.constant 0 : index
    %21 = vector.load %arg12[%c0_18, %c0_19] : memref<16x32xbf16, #tpu.memory_space<vmem>>, vector<16x32xbf16>
    tpu.vector_store %arg12[%c0_18, %c0_19], %20 {strides = array<i32>} : memref<16x32xbf16, #tpu.memory_space<vmem>>, vector<16x32xbf16>,
    return
  }
  func.func @transform_0(%arg0: i32, %arg1: i32) -> (i32, i32) {
    %c0_i32 = arith.constant 0 : i32
    %c0_i32_0 = arith.constant 0 : i32
    return %arg0, %c0_i32 : i32, i32
  }
  func.func @transform_1(%arg0: i32, %arg1: i32) -> (i32, i32) {
    %c0_i32 = arith.constant 0 : i32
    %c0_i32_0 = arith.constant 0 : i32
    %c0_i32_1 = arith.constant 0 : i32
    return %c0_i32, %c0_i32_0 : i32, i32
  }
  func.func @transform_2(%arg0: i32, %arg1: i32) -> (i32, i32) {
    %c0_i32 = arith.constant 0 : i32
    %c0_i32_0 = arith.constant 0 : i32
    %c0_i32_1 = arith.constant 0 : i32
    return %c0_i32, %c0_i32_0 : i32, i32
  }
  func.func @transform_3(%arg0: i32, %arg1: i32) -> (i32, i32) {
    %c0_i32 = arith.constant 0 : i32
    %c0_i32_0 = arith.constant 0 : i32
    return %c0_i32, %arg1 : i32, i32
  }
  func.func @transform_4(%arg0: i32, %arg1: i32) -> (i32, i32) {
    %c0_i32 = arith.constant 0 : i32
    %c0_i32_0 = arith.constant 0 : i32
    return %c0_i32, %arg1 : i32, i32
  }
  func.func @transform_5(%arg0: i32, %arg1: i32) -> (i32, i32) {
    %c0_i32 = arith.constant 0 : i32
    %c0_i32_0 = arith.constant 0 : i32
    return %c0_i32, %arg1 : i32, i32
  }
  func.func @transform_6(%arg0: i32, %arg1: i32) -> (i32, i32) {
    %c0_i32 = arith.constant 0 : i32
    %c0_i32_0 = arith.constant 0 : i32
    return %c0_i32, %arg1 : i32, i32
  }
  func.func @transform_7(%arg0: i32, %arg1: i32) -> (i32, i32) {
    %c0_i32 = arith.constant 0 : i32
    %c0_i32_0 = arith.constant 0 : i32
    return %c0_i32, %arg1 : i32, i32
  }
  func.func @transform_8(%arg0: i32, %arg1: i32) -> (i32, i32) {
    %c0_i32 = arith.constant 0 : i32
    return %arg0, %arg1 : i32, i32
  }
  func.func @transform_9(%arg0: i32, %arg1: i32) -> (i32, i32) {
    %c0_i32 = arith.constant 0 : i32
    return %arg0, %arg1 : i32, i32
  }
  func.func @transform_10(%arg0: i32, %arg1: i32) -> (i32, i32) {
    %c0_i32 = arith.constant 0 : i32
    return %arg0, %arg1 : i32, i32
  }
}

module attributes {stable_mosaic.version = 11 : i64} {
  func.func @_flash_attn_kernel(%arg0: i32, %arg1: i32, %arg2: i32, %arg3: memref<1x8x32xbf16, #tpu.memory_space<vmem>>, %arg4: memref<1x8x32xbf16, #tpu.memory_space<vmem>>, %arg5: memref<1x8x32xbf16, #tpu.memory_space<vmem>>, %arg6: memref<1x8x32xbf16, #tpu.memory_space<vmem>>, %arg7: memref<8x32xbf16, #tpu.memory_space<vmem>>, %arg8: memref<4x8x1xf32, #tpu.memory_space<vmem>>, %arg9: memref<4x8x1xf32, #tpu.memory_space<vmem>>, %arg10: memref<4x8x8xf32, #tpu.memory_space<vmem>>) attributes {dimension_semantics = [#tpu.dimension_semantics<parallel>, #tpu.dimension_semantics<parallel>, #tpu.dimension_semantics<arbitrary>], iteration_bounds = array<i64: 2, 1, 1>, scalar_prefetch = 0 : i64, scratch_operands = 4 : i64, tpu.core_type = #tpu.core_type<tc>, window_params = [{transform_indices = @transform_0, window_bounds = array<i64: 1, 8, 32>}, {transform_indices = @transform_1, window_bounds = array<i64: 1, 8, 32>}, {transform_indices = @transform_2, window_bounds = array<i64: 1, 8, 32>}, {transform_indices = @transform_3, window_bounds = array<i64: 1, 8, 32>}]} {
    %c0_i32 = arith.constant 0 : i32
    %0 = arith.cmpi eq, %arg2, %c0_i32 : i32
    %1 = arith.extui %0 : i1 to i32
    %c0_i32_0 = arith.constant 0 : i32
    %2 = arith.cmpi ne, %1, %c0_i32_0 : i32
    scf.if %2 {
      %c0_94 = arith.constant 0 : index
      %c0_95 = arith.constant 0 : index
      %c0_96 = arith.constant 0 : index
      %155 = vector.load %arg3[%c0_94, %c0_95, %c0_96] : memref<1x8x32xbf16, #tpu.memory_space<vmem>>, vector<1x8x32xbf16>
      %156 = vector.shape_cast %155 : vector<1x8x32xbf16> to vector<8x32xbf16>
      %157 = arith.extf %156 : vector<8x32xbf16> to vector<8x32xf32>
      %cst_97 = arith.constant 0.353553385 : f32
      %158 = vector.broadcast %cst_97 : f32 to vector<8x32xf32>
      %159 = arith.mulf %157, %158 : vector<8x32xf32>
      %160 = arith.truncf %159 : vector<8x32xf32> to vector<8x32xbf16>
      %c0_98 = arith.constant 0 : index
      %c0_99 = arith.constant 0 : index
      %161 = vector.load %arg7[%c0_98, %c0_99] : memref<8x32xbf16, #tpu.memory_space<vmem>>, vector<8x32xbf16>
      tpu.vector_store %arg7[%c0_98, %c0_99], %160 {strides = array<i32>} : memref<8x32xbf16, #tpu.memory_space<vmem>>, vector<8x32xbf16>,
      %cst_100 = arith.constant 0xFF800000 : f32
      %162 = vector.broadcast %cst_100 : f32 to vector<4x8x1xf32>
      %c0_101 = arith.constant 0 : index
      %c0_102 = arith.constant 0 : index
      %c0_103 = arith.constant 0 : index
      %163 = vector.load %arg8[%c0_101, %c0_102, %c0_103] : memref<4x8x1xf32, #tpu.memory_space<vmem>>, vector<4x8x1xf32>
      tpu.vector_store %arg8[%c0_101, %c0_102, %c0_103], %162 {strides = array<i32>} : memref<4x8x1xf32, #tpu.memory_space<vmem>>, vector<4x8x1xf32>,
      %cst_104 = arith.constant 0.000000e+00 : f32
      %164 = vector.broadcast %cst_104 : f32 to vector<4x8x1xf32>
      %c0_105 = arith.constant 0 : index
      %c0_106 = arith.constant 0 : index
      %c0_107 = arith.constant 0 : index
      %165 = vector.load %arg9[%c0_105, %c0_106, %c0_107] : memref<4x8x1xf32, #tpu.memory_space<vmem>>, vector<4x8x1xf32>
      tpu.vector_store %arg9[%c0_105, %c0_106, %c0_107], %164 {strides = array<i32>} : memref<4x8x1xf32, #tpu.memory_space<vmem>>, vector<4x8x1xf32>,
      %cst_108 = arith.constant 0.000000e+00 : f32
      %166 = vector.broadcast %cst_108 : f32 to vector<4x8x8xf32>
      %c0_109 = arith.constant 0 : index
      %c0_110 = arith.constant 0 : index
      %c0_111 = arith.constant 0 : index
      %167 = vector.load %arg10[%c0_109, %c0_110, %c0_111] : memref<4x8x8xf32, #tpu.memory_space<vmem>>, vector<4x8x8xf32>
      tpu.vector_store %arg10[%c0_109, %c0_110, %c0_111], %166 {strides = array<i32>} : memref<4x8x8xf32, #tpu.memory_space<vmem>>, vector<4x8x8xf32>,
    } else {
    }
    %c0 = arith.constant 0 : index
    %c0_1 = arith.constant 0 : index
    %3 = vector.load %arg7[%c0, %c0_1] : memref<8x32xbf16, #tpu.memory_space<vmem>>, vector<8x32xbf16>
    %c0_2 = arith.constant 0 : index
    %c0_3 = arith.constant 0 : index
    %c0_4 = arith.constant 0 : index
    %4 = vector.load %arg4[%c0_2, %c0_3, %c0_4] : memref<1x8x32xbf16, #tpu.memory_space<vmem>>, vector<1x8x32xbf16>
    %5 = vector.shape_cast %4 : vector<1x8x32xbf16> to vector<8x32xbf16>
    %c0_5 = arith.constant 0 : index
    %c0_6 = arith.constant 0 : index
    %c0_7 = arith.constant 0 : index
    %6 = vector.load %arg5[%c0_5, %c0_6, %c0_7] : memref<1x8x32xbf16, #tpu.memory_space<vmem>>, vector<1x8x32xbf16>
    %7 = vector.shape_cast %6 : vector<1x8x32xbf16> to vector<8x32xbf16>
    %8 = vector.extract_strided_slice %3 {offsets = [0, 0], sizes = [8, 8], strides = [1, 1]} : vector<8x32xbf16> to vector<8x8xbf16>
    %9 = vector.extract_strided_slice %5 {offsets = [0, 0], sizes = [8, 8], strides = [1, 1]} : vector<8x32xbf16> to vector<8x8xbf16>
    %cst = arith.constant dense<0.000000e+00> : vector<8x8xf32>
    %10 = tpu.matmul %8, %9, %cst {dimension_numbers = #tpu.dot_dimension_numbers<[1], [1], [0], [0], [0, 0, 1, 0], [], []>} : vector<8x8xbf16>, vector<8x8xbf16>, vector<8x8xf32> -> vector<8x8xf32>
    %c0_8 = arith.constant 0 : index
    %c0_9 = arith.constant 0 : index
    %c0_10 = arith.constant 0 : index
    %11 = vector.load %arg8[%c0_8, %c0_9, %c0_10] : memref<4x8x1xf32, #tpu.memory_space<vmem>>, vector<1x8x1xf32>
    %12 = vector.shape_cast %11 : vector<1x8x1xf32> to vector<8x1xf32>
    %cst_11 = arith.constant dense<0xFF800000> : vector<8xf32>
    %13 = vector.multi_reduction <maximumf>, %10, %cst_11 [1] : vector<8x8xf32> to vector<8xf32>
    %14 = vector.shape_cast %13 : vector<8xf32> to vector<8x1xf32>
    %15 = arith.maximumf %12, %14 : vector<8x1xf32>
    %16 = arith.subf %12, %15 : vector<8x1xf32>
    %17 = math.exp %16 : vector<8x1xf32>
    %18 = vector.broadcast %15 : vector<8x1xf32> to vector<8x8xf32>
    %19 = arith.subf %10, %18 : vector<8x8xf32>
    %20 = math.exp %19 : vector<8x8xf32>
    %c0_12 = arith.constant 0 : index
    %c0_13 = arith.constant 0 : index
    %c0_14 = arith.constant 0 : index
    %21 = vector.load %arg9[%c0_12, %c0_13, %c0_14] : memref<4x8x1xf32, #tpu.memory_space<vmem>>, vector<1x8x1xf32>
    %22 = vector.shape_cast %21 : vector<1x8x1xf32> to vector<8x1xf32>
    %23 = arith.mulf %17, %22 : vector<8x1xf32>
    %cst_15 = arith.constant dense<0.000000e+00> : vector<8xf32>
    %24 = vector.multi_reduction <add>, %20, %cst_15 [1] : vector<8x8xf32> to vector<8xf32>
    %25 = vector.shape_cast %24 : vector<8xf32> to vector<8x1xf32>
    %26 = arith.addf %23, %25 : vector<8x1xf32>
    %c0_16 = arith.constant 0 : index
    %c0_17 = arith.constant 0 : index
    %c0_18 = arith.constant 0 : index
    %27 = vector.load %arg9[%c0_16, %c0_17, %c0_18] : memref<4x8x1xf32, #tpu.memory_space<vmem>>, vector<1x8x1xf32>
    %28 = vector.shape_cast %27 : vector<1x8x1xf32> to vector<8x1xf32>
    %29 = vector.shape_cast %26 : vector<8x1xf32> to vector<1x8x1xf32>
    tpu.vector_store %arg9[%c0_16, %c0_17, %c0_18], %29 {strides = array<i32>} : memref<4x8x1xf32, #tpu.memory_space<vmem>>, vector<1x8x1xf32>,
    %30 = arith.truncf %20 : vector<8x8xf32> to vector<8x8xbf16>
    %31 = vector.extract_strided_slice %7 {offsets = [0, 0], sizes = [8, 8], strides = [1, 1]} : vector<8x32xbf16> to vector<8x8xbf16>
    %cst_19 = arith.constant dense<0.000000e+00> : vector<8x8xf32>
    %32 = tpu.matmul %30, %31, %cst_19 {dimension_numbers = #tpu.dot_dimension_numbers<[1], [0], [0], [1], [0, 0, 1, 1], [], []>} : vector<8x8xbf16>, vector<8x8xbf16>, vector<8x8xf32> -> vector<8x8xf32>
    %c0_20 = arith.constant 0 : index
    %c0_21 = arith.constant 0 : index
    %c0_22 = arith.constant 0 : index
    %33 = vector.load %arg10[%c0_20, %c0_21, %c0_22] : memref<4x8x8xf32, #tpu.memory_space<vmem>>, vector<1x8x8xf32>
    %34 = vector.shape_cast %33 : vector<1x8x8xf32> to vector<8x8xf32>
    %35 = vector.broadcast %17 : vector<8x1xf32> to vector<8x8xf32>
    %36 = arith.mulf %35, %34 : vector<8x8xf32>
    %37 = arith.addf %36, %32 : vector<8x8xf32>
    %c0_23 = arith.constant 0 : index
    %c0_24 = arith.constant 0 : index
    %c0_25 = arith.constant 0 : index
    %38 = vector.load %arg10[%c0_23, %c0_24, %c0_25] : memref<4x8x8xf32, #tpu.memory_space<vmem>>, vector<1x8x8xf32>
    %39 = vector.shape_cast %38 : vector<1x8x8xf32> to vector<8x8xf32>
    %40 = vector.shape_cast %37 : vector<8x8xf32> to vector<1x8x8xf32>
    tpu.vector_store %arg10[%c0_23, %c0_24, %c0_25], %40 {strides = array<i32>} : memref<4x8x8xf32, #tpu.memory_space<vmem>>, vector<1x8x8xf32>,
    %c0_26 = arith.constant 0 : index
    %c0_27 = arith.constant 0 : index
    %c0_28 = arith.constant 0 : index
    %41 = vector.load %arg8[%c0_26, %c0_27, %c0_28] : memref<4x8x1xf32, #tpu.memory_space<vmem>>, vector<1x8x1xf32>
    %42 = vector.shape_cast %41 : vector<1x8x1xf32> to vector<8x1xf32>
    %43 = vector.shape_cast %15 : vector<8x1xf32> to vector<1x8x1xf32>
    tpu.vector_store %arg8[%c0_26, %c0_27, %c0_28], %43 {strides = array<i32>} : memref<4x8x1xf32, #tpu.memory_space<vmem>>, vector<1x8x1xf32>,
    %44 = vector.extract_strided_slice %3 {offsets = [0, 8], sizes = [8, 8], strides = [1, 1]} : vector<8x32xbf16> to vector<8x8xbf16>
    %45 = vector.extract_strided_slice %5 {offsets = [0, 8], sizes = [8, 8], strides = [1, 1]} : vector<8x32xbf16> to vector<8x8xbf16>
    %cst_29 = arith.constant dense<0.000000e+00> : vector<8x8xf32>
    %46 = tpu.matmul %44, %45, %cst_29 {dimension_numbers = #tpu.dot_dimension_numbers<[1], [1], [0], [0], [0, 0, 1, 0], [], []>} : vector<8x8xbf16>, vector<8x8xbf16>, vector<8x8xf32> -> vector<8x8xf32>
    %c1 = arith.constant 1 : index
    %c0_30 = arith.constant 0 : index
    %c0_31 = arith.constant 0 : index
    %47 = vector.load %arg8[%c1, %c0_30, %c0_31] : memref<4x8x1xf32, #tpu.memory_space<vmem>>, vector<1x8x1xf32>
    %48 = vector.shape_cast %47 : vector<1x8x1xf32> to vector<8x1xf32>
    %cst_32 = arith.constant dense<0xFF800000> : vector<8xf32>
    %49 = vector.multi_reduction <maximumf>, %46, %cst_32 [1] : vector<8x8xf32> to vector<8xf32>
    %50 = vector.shape_cast %49 : vector<8xf32> to vector<8x1xf32>
    %51 = arith.maximumf %48, %50 : vector<8x1xf32>
    %52 = arith.subf %48, %51 : vector<8x1xf32>
    %53 = math.exp %52 : vector<8x1xf32>
    %54 = vector.broadcast %51 : vector<8x1xf32> to vector<8x8xf32>
    %55 = arith.subf %46, %54 : vector<8x8xf32>
    %56 = math.exp %55 : vector<8x8xf32>
    %c1_33 = arith.constant 1 : index
    %c0_34 = arith.constant 0 : index
    %c0_35 = arith.constant 0 : index
    %57 = vector.load %arg9[%c1_33, %c0_34, %c0_35] : memref<4x8x1xf32, #tpu.memory_space<vmem>>, vector<1x8x1xf32>
    %58 = vector.shape_cast %57 : vector<1x8x1xf32> to vector<8x1xf32>
    %59 = arith.mulf %53, %58 : vector<8x1xf32>
    %cst_36 = arith.constant dense<0.000000e+00> : vector<8xf32>
    %60 = vector.multi_reduction <add>, %56, %cst_36 [1] : vector<8x8xf32> to vector<8xf32>
    %61 = vector.shape_cast %60 : vector<8xf32> to vector<8x1xf32>
    %62 = arith.addf %59, %61 : vector<8x1xf32>
    %c1_37 = arith.constant 1 : index
    %c0_38 = arith.constant 0 : index
    %c0_39 = arith.constant 0 : index
    %63 = vector.load %arg9[%c1_37, %c0_38, %c0_39] : memref<4x8x1xf32, #tpu.memory_space<vmem>>, vector<1x8x1xf32>
    %64 = vector.shape_cast %63 : vector<1x8x1xf32> to vector<8x1xf32>
    %65 = vector.shape_cast %62 : vector<8x1xf32> to vector<1x8x1xf32>
    tpu.vector_store %arg9[%c1_37, %c0_38, %c0_39], %65 {strides = array<i32>} : memref<4x8x1xf32, #tpu.memory_space<vmem>>, vector<1x8x1xf32>,
    %66 = arith.truncf %56 : vector<8x8xf32> to vector<8x8xbf16>
    %67 = vector.extract_strided_slice %7 {offsets = [0, 8], sizes = [8, 8], strides = [1, 1]} : vector<8x32xbf16> to vector<8x8xbf16>
    %cst_40 = arith.constant dense<0.000000e+00> : vector<8x8xf32>
    %68 = tpu.matmul %66, %67, %cst_40 {dimension_numbers = #tpu.dot_dimension_numbers<[1], [0], [0], [1], [0, 0, 1, 1], [], []>} : vector<8x8xbf16>, vector<8x8xbf16>, vector<8x8xf32> -> vector<8x8xf32>
    %c1_41 = arith.constant 1 : index
    %c0_42 = arith.constant 0 : index
    %c0_43 = arith.constant 0 : index
    %69 = vector.load %arg10[%c1_41, %c0_42, %c0_43] : memref<4x8x8xf32, #tpu.memory_space<vmem>>, vector<1x8x8xf32>
    %70 = vector.shape_cast %69 : vector<1x8x8xf32> to vector<8x8xf32>
    %71 = vector.broadcast %53 : vector<8x1xf32> to vector<8x8xf32>
    %72 = arith.mulf %71, %70 : vector<8x8xf32>
    %73 = arith.addf %72, %68 : vector<8x8xf32>
    %c1_44 = arith.constant 1 : index
    %c0_45 = arith.constant 0 : index
    %c0_46 = arith.constant 0 : index
    %74 = vector.load %arg10[%c1_44, %c0_45, %c0_46] : memref<4x8x8xf32, #tpu.memory_space<vmem>>, vector<1x8x8xf32>
    %75 = vector.shape_cast %74 : vector<1x8x8xf32> to vector<8x8xf32>
    %76 = vector.shape_cast %73 : vector<8x8xf32> to vector<1x8x8xf32>
    tpu.vector_store %arg10[%c1_44, %c0_45, %c0_46], %76 {strides = array<i32>} : memref<4x8x8xf32, #tpu.memory_space<vmem>>, vector<1x8x8xf32>,
    %c1_47 = arith.constant 1 : index
    %c0_48 = arith.constant 0 : index
    %c0_49 = arith.constant 0 : index
    %77 = vector.load %arg8[%c1_47, %c0_48, %c0_49] : memref<4x8x1xf32, #tpu.memory_space<vmem>>, vector<1x8x1xf32>
    %78 = vector.shape_cast %77 : vector<1x8x1xf32> to vector<8x1xf32>
    %79 = vector.shape_cast %51 : vector<8x1xf32> to vector<1x8x1xf32>
    tpu.vector_store %arg8[%c1_47, %c0_48, %c0_49], %79 {strides = array<i32>} : memref<4x8x1xf32, #tpu.memory_space<vmem>>, vector<1x8x1xf32>,
    %80 = vector.extract_strided_slice %3 {offsets = [0, 16], sizes = [8, 8], strides = [1, 1]} : vector<8x32xbf16> to vector<8x8xbf16>
    %81 = vector.extract_strided_slice %5 {offsets = [0, 16], sizes = [8, 8], strides = [1, 1]} : vector<8x32xbf16> to vector<8x8xbf16>
    %cst_50 = arith.constant dense<0.000000e+00> : vector<8x8xf32>
    %82 = tpu.matmul %80, %81, %cst_50 {dimension_numbers = #tpu.dot_dimension_numbers<[1], [1], [0], [0], [0, 0, 1, 0], [], []>} : vector<8x8xbf16>, vector<8x8xbf16>, vector<8x8xf32> -> vector<8x8xf32>
    %c2 = arith.constant 2 : index
    %c0_51 = arith.constant 0 : index
    %c0_52 = arith.constant 0 : index
    %83 = vector.load %arg8[%c2, %c0_51, %c0_52] : memref<4x8x1xf32, #tpu.memory_space<vmem>>, vector<1x8x1xf32>
    %84 = vector.shape_cast %83 : vector<1x8x1xf32> to vector<8x1xf32>
    %cst_53 = arith.constant dense<0xFF800000> : vector<8xf32>
    %85 = vector.multi_reduction <maximumf>, %82, %cst_53 [1] : vector<8x8xf32> to vector<8xf32>
    %86 = vector.shape_cast %85 : vector<8xf32> to vector<8x1xf32>
    %87 = arith.maximumf %84, %86 : vector<8x1xf32>
    %88 = arith.subf %84, %87 : vector<8x1xf32>
    %89 = math.exp %88 : vector<8x1xf32>
    %90 = vector.broadcast %87 : vector<8x1xf32> to vector<8x8xf32>
    %91 = arith.subf %82, %90 : vector<8x8xf32>
    %92 = math.exp %91 : vector<8x8xf32>
    %c2_54 = arith.constant 2 : index
    %c0_55 = arith.constant 0 : index
    %c0_56 = arith.constant 0 : index
    %93 = vector.load %arg9[%c2_54, %c0_55, %c0_56] : memref<4x8x1xf32, #tpu.memory_space<vmem>>, vector<1x8x1xf32>
    %94 = vector.shape_cast %93 : vector<1x8x1xf32> to vector<8x1xf32>
    %95 = arith.mulf %89, %94 : vector<8x1xf32>
    %cst_57 = arith.constant dense<0.000000e+00> : vector<8xf32>
    %96 = vector.multi_reduction <add>, %92, %cst_57 [1] : vector<8x8xf32> to vector<8xf32>
    %97 = vector.shape_cast %96 : vector<8xf32> to vector<8x1xf32>
    %98 = arith.addf %95, %97 : vector<8x1xf32>
    %c2_58 = arith.constant 2 : index
    %c0_59 = arith.constant 0 : index
    %c0_60 = arith.constant 0 : index
    %99 = vector.load %arg9[%c2_58, %c0_59, %c0_60] : memref<4x8x1xf32, #tpu.memory_space<vmem>>, vector<1x8x1xf32>
    %100 = vector.shape_cast %99 : vector<1x8x1xf32> to vector<8x1xf32>
    %101 = vector.shape_cast %98 : vector<8x1xf32> to vector<1x8x1xf32>
    tpu.vector_store %arg9[%c2_58, %c0_59, %c0_60], %101 {strides = array<i32>} : memref<4x8x1xf32, #tpu.memory_space<vmem>>, vector<1x8x1xf32>,
    %102 = arith.truncf %92 : vector<8x8xf32> to vector<8x8xbf16>
    %103 = vector.extract_strided_slice %7 {offsets = [0, 16], sizes = [8, 8], strides = [1, 1]} : vector<8x32xbf16> to vector<8x8xbf16>
    %cst_61 = arith.constant dense<0.000000e+00> : vector<8x8xf32>
    %104 = tpu.matmul %102, %103, %cst_61 {dimension_numbers = #tpu.dot_dimension_numbers<[1], [0], [0], [1], [0, 0, 1, 1], [], []>} : vector<8x8xbf16>, vector<8x8xbf16>, vector<8x8xf32> -> vector<8x8xf32>
    %c2_62 = arith.constant 2 : index
    %c0_63 = arith.constant 0 : index
    %c0_64 = arith.constant 0 : index
    %105 = vector.load %arg10[%c2_62, %c0_63, %c0_64] : memref<4x8x8xf32, #tpu.memory_space<vmem>>, vector<1x8x8xf32>
    %106 = vector.shape_cast %105 : vector<1x8x8xf32> to vector<8x8xf32>
    %107 = vector.broadcast %89 : vector<8x1xf32> to vector<8x8xf32>
    %108 = arith.mulf %107, %106 : vector<8x8xf32>
    %109 = arith.addf %108, %104 : vector<8x8xf32>
    %c2_65 = arith.constant 2 : index
    %c0_66 = arith.constant 0 : index
    %c0_67 = arith.constant 0 : index
    %110 = vector.load %arg10[%c2_65, %c0_66, %c0_67] : memref<4x8x8xf32, #tpu.memory_space<vmem>>, vector<1x8x8xf32>
    %111 = vector.shape_cast %110 : vector<1x8x8xf32> to vector<8x8xf32>
    %112 = vector.shape_cast %109 : vector<8x8xf32> to vector<1x8x8xf32>
    tpu.vector_store %arg10[%c2_65, %c0_66, %c0_67], %112 {strides = array<i32>} : memref<4x8x8xf32, #tpu.memory_space<vmem>>, vector<1x8x8xf32>,
    %c2_68 = arith.constant 2 : index
    %c0_69 = arith.constant 0 : index
    %c0_70 = arith.constant 0 : index
    %113 = vector.load %arg8[%c2_68, %c0_69, %c0_70] : memref<4x8x1xf32, #tpu.memory_space<vmem>>, vector<1x8x1xf32>
    %114 = vector.shape_cast %113 : vector<1x8x1xf32> to vector<8x1xf32>
    %115 = vector.shape_cast %87 : vector<8x1xf32> to vector<1x8x1xf32>
    tpu.vector_store %arg8[%c2_68, %c0_69, %c0_70], %115 {strides = array<i32>} : memref<4x8x1xf32, #tpu.memory_space<vmem>>, vector<1x8x1xf32>,
    %116 = vector.extract_strided_slice %3 {offsets = [0, 24], sizes = [8, 8], strides = [1, 1]} : vector<8x32xbf16> to vector<8x8xbf16>
    %117 = vector.extract_strided_slice %5 {offsets = [0, 24], sizes = [8, 8], strides = [1, 1]} : vector<8x32xbf16> to vector<8x8xbf16>
    %cst_71 = arith.constant dense<0.000000e+00> : vector<8x8xf32>
    %118 = tpu.matmul %116, %117, %cst_71 {dimension_numbers = #tpu.dot_dimension_numbers<[1], [1], [0], [0], [0, 0, 1, 0], [], []>} : vector<8x8xbf16>, vector<8x8xbf16>, vector<8x8xf32> -> vector<8x8xf32>
    %c3 = arith.constant 3 : index
    %c0_72 = arith.constant 0 : index
    %c0_73 = arith.constant 0 : index
    %119 = vector.load %arg8[%c3, %c0_72, %c0_73] : memref<4x8x1xf32, #tpu.memory_space<vmem>>, vector<1x8x1xf32>
    %120 = vector.shape_cast %119 : vector<1x8x1xf32> to vector<8x1xf32>
    %cst_74 = arith.constant dense<0xFF800000> : vector<8xf32>
    %121 = vector.multi_reduction <maximumf>, %118, %cst_74 [1] : vector<8x8xf32> to vector<8xf32>
    %122 = vector.shape_cast %121 : vector<8xf32> to vector<8x1xf32>
    %123 = arith.maximumf %120, %122 : vector<8x1xf32>
    %124 = arith.subf %120, %123 : vector<8x1xf32>
    %125 = math.exp %124 : vector<8x1xf32>
    %126 = vector.broadcast %123 : vector<8x1xf32> to vector<8x8xf32>
    %127 = arith.subf %118, %126 : vector<8x8xf32>
    %128 = math.exp %127 : vector<8x8xf32>
    %c3_75 = arith.constant 3 : index
    %c0_76 = arith.constant 0 : index
    %c0_77 = arith.constant 0 : index
    %129 = vector.load %arg9[%c3_75, %c0_76, %c0_77] : memref<4x8x1xf32, #tpu.memory_space<vmem>>, vector<1x8x1xf32>
    %130 = vector.shape_cast %129 : vector<1x8x1xf32> to vector<8x1xf32>
    %131 = arith.mulf %125, %130 : vector<8x1xf32>
    %cst_78 = arith.constant dense<0.000000e+00> : vector<8xf32>
    %132 = vector.multi_reduction <add>, %128, %cst_78 [1] : vector<8x8xf32> to vector<8xf32>
    %133 = vector.shape_cast %132 : vector<8xf32> to vector<8x1xf32>
    %134 = arith.addf %131, %133 : vector<8x1xf32>
    %c3_79 = arith.constant 3 : index
    %c0_80 = arith.constant 0 : index
    %c0_81 = arith.constant 0 : index
    %135 = vector.load %arg9[%c3_79, %c0_80, %c0_81] : memref<4x8x1xf32, #tpu.memory_space<vmem>>, vector<1x8x1xf32>
    %136 = vector.shape_cast %135 : vector<1x8x1xf32> to vector<8x1xf32>
    %137 = vector.shape_cast %134 : vector<8x1xf32> to vector<1x8x1xf32>
    tpu.vector_store %arg9[%c3_79, %c0_80, %c0_81], %137 {strides = array<i32>} : memref<4x8x1xf32, #tpu.memory_space<vmem>>, vector<1x8x1xf32>,
    %138 = arith.truncf %128 : vector<8x8xf32> to vector<8x8xbf16>
    %139 = vector.extract_strided_slice %7 {offsets = [0, 24], sizes = [8, 8], strides = [1, 1]} : vector<8x32xbf16> to vector<8x8xbf16>
    %cst_82 = arith.constant dense<0.000000e+00> : vector<8x8xf32>
    %140 = tpu.matmul %138, %139, %cst_82 {dimension_numbers = #tpu.dot_dimension_numbers<[1], [0], [0], [1], [0, 0, 1, 1], [], []>} : vector<8x8xbf16>, vector<8x8xbf16>, vector<8x8xf32> -> vector<8x8xf32>
    %c3_83 = arith.constant 3 : index
    %c0_84 = arith.constant 0 : index
    %c0_85 = arith.constant 0 : index
    %141 = vector.load %arg10[%c3_83, %c0_84, %c0_85] : memref<4x8x8xf32, #tpu.memory_space<vmem>>, vector<1x8x8xf32>
    %142 = vector.shape_cast %141 : vector<1x8x8xf32> to vector<8x8xf32>
    %143 = vector.broadcast %125 : vector<8x1xf32> to vector<8x8xf32>
    %144 = arith.mulf %143, %142 : vector<8x8xf32>
    %145 = arith.addf %144, %140 : vector<8x8xf32>
    %c3_86 = arith.constant 3 : index
    %c0_87 = arith.constant 0 : index
    %c0_88 = arith.constant 0 : index
    %146 = vector.load %arg10[%c3_86, %c0_87, %c0_88] : memref<4x8x8xf32, #tpu.memory_space<vmem>>, vector<1x8x8xf32>
    %147 = vector.shape_cast %146 : vector<1x8x8xf32> to vector<8x8xf32>
    %148 = vector.shape_cast %145 : vector<8x8xf32> to vector<1x8x8xf32>
    tpu.vector_store %arg10[%c3_86, %c0_87, %c0_88], %148 {strides = array<i32>} : memref<4x8x8xf32, #tpu.memory_space<vmem>>, vector<1x8x8xf32>,
    %c3_89 = arith.constant 3 : index
    %c0_90 = arith.constant 0 : index
    %c0_91 = arith.constant 0 : index
    %149 = vector.load %arg8[%c3_89, %c0_90, %c0_91] : memref<4x8x1xf32, #tpu.memory_space<vmem>>, vector<1x8x1xf32>
    %150 = vector.shape_cast %149 : vector<1x8x1xf32> to vector<8x1xf32>
    %151 = vector.shape_cast %123 : vector<8x1xf32> to vector<1x8x1xf32>
    tpu.vector_store %arg8[%c3_89, %c0_90, %c0_91], %151 {strides = array<i32>} : memref<4x8x1xf32, #tpu.memory_space<vmem>>, vector<1x8x1xf32>,
    %c0_i32_92 = arith.constant 0 : i32
    %152 = arith.cmpi eq, %arg2, %c0_i32_92 : i32
    %153 = arith.extui %152 : i1 to i32
    %c0_i32_93 = arith.constant 0 : i32
    %154 = arith.cmpi ne, %153, %c0_i32_93 : i32
    scf.if %154 {
      %c0_94 = arith.constant 0 : index
      %c0_95 = arith.constant 0 : index
      %c0_96 = arith.constant 0 : index
      %155 = vector.load %arg9[%c0_94, %c0_95, %c0_96] : memref<4x8x1xf32, #tpu.memory_space<vmem>>, vector<1x8x1xf32>
      %156 = vector.shape_cast %155 : vector<1x8x1xf32> to vector<8x1xf32>
      %157 = tpu.reciprocal %156 {approx = true} : vector<8x1xf32> -> vector<8x1xf32>
      %c0_97 = arith.constant 0 : index
      %c0_98 = arith.constant 0 : index
      %c0_99 = arith.constant 0 : index
      %158 = vector.load %arg10[%c0_97, %c0_98, %c0_99] : memref<4x8x8xf32, #tpu.memory_space<vmem>>, vector<1x8x8xf32>
      %159 = vector.shape_cast %158 : vector<1x8x8xf32> to vector<8x8xf32>
      %160 = vector.broadcast %157 : vector<8x1xf32> to vector<8x8xf32>
      %161 = arith.mulf %159, %160 : vector<8x8xf32>
      %162 = arith.truncf %161 : vector<8x8xf32> to vector<8x8xbf16>
      %c0_100 = arith.constant 0 : index
      %c0_101 = arith.constant 0 : index
      %c0_102 = arith.constant 0 : index
      %163 = vector.load %arg6[%c0_100, %c0_101, %c0_102] : memref<1x8x32xbf16, #tpu.memory_space<vmem>>, vector<1x8x8xbf16>
      %164 = vector.shape_cast %163 : vector<1x8x8xbf16> to vector<8x8xbf16>
      %165 = vector.shape_cast %162 : vector<8x8xbf16> to vector<1x8x8xbf16>
      tpu.vector_store %arg6[%c0_100, %c0_101, %c0_102], %165 {strides = array<i32>} : memref<1x8x32xbf16, #tpu.memory_space<vmem>>, vector<1x8x8xbf16>,
      %c1_103 = arith.constant 1 : index
      %c0_104 = arith.constant 0 : index
      %c0_105 = arith.constant 0 : index
      %166 = vector.load %arg9[%c1_103, %c0_104, %c0_105] : memref<4x8x1xf32, #tpu.memory_space<vmem>>, vector<1x8x1xf32>
      %167 = vector.shape_cast %166 : vector<1x8x1xf32> to vector<8x1xf32>
      %168 = tpu.reciprocal %167 {approx = true} : vector<8x1xf32> -> vector<8x1xf32>
      %c1_106 = arith.constant 1 : index
      %c0_107 = arith.constant 0 : index
      %c0_108 = arith.constant 0 : index
      %169 = vector.load %arg10[%c1_106, %c0_107, %c0_108] : memref<4x8x8xf32, #tpu.memory_space<vmem>>, vector<1x8x8xf32>
      %170 = vector.shape_cast %169 : vector<1x8x8xf32> to vector<8x8xf32>
      %171 = vector.broadcast %168 : vector<8x1xf32> to vector<8x8xf32>
      %172 = arith.mulf %170, %171 : vector<8x8xf32>
      %173 = arith.truncf %172 : vector<8x8xf32> to vector<8x8xbf16>
      %c0_109 = arith.constant 0 : index
      %c0_110 = arith.constant 0 : index
      %c8 = arith.constant 8 : index
      %174 = vector.load %arg6[%c0_109, %c0_110, %c8] : memref<1x8x32xbf16, #tpu.memory_space<vmem>>, vector<1x8x8xbf16>
      %175 = vector.shape_cast %174 : vector<1x8x8xbf16> to vector<8x8xbf16>
      %176 = vector.shape_cast %173 : vector<8x8xbf16> to vector<1x8x8xbf16>
      tpu.vector_store %arg6[%c0_109, %c0_110, %c8], %176 {strides = array<i32>} : memref<1x8x32xbf16, #tpu.memory_space<vmem>>, vector<1x8x8xbf16>,
      %c2_111 = arith.constant 2 : index
      %c0_112 = arith.constant 0 : index
      %c0_113 = arith.constant 0 : index
      %177 = vector.load %arg9[%c2_111, %c0_112, %c0_113] : memref<4x8x1xf32, #tpu.memory_space<vmem>>, vector<1x8x1xf32>
      %178 = vector.shape_cast %177 : vector<1x8x1xf32> to vector<8x1xf32>
      %179 = tpu.reciprocal %178 {approx = true} : vector<8x1xf32> -> vector<8x1xf32>
      %c2_114 = arith.constant 2 : index
      %c0_115 = arith.constant 0 : index
      %c0_116 = arith.constant 0 : index
      %180 = vector.load %arg10[%c2_114, %c0_115, %c0_116] : memref<4x8x8xf32, #tpu.memory_space<vmem>>, vector<1x8x8xf32>
      %181 = vector.shape_cast %180 : vector<1x8x8xf32> to vector<8x8xf32>
      %182 = vector.broadcast %179 : vector<8x1xf32> to vector<8x8xf32>
      %183 = arith.mulf %181, %182 : vector<8x8xf32>
      %184 = arith.truncf %183 : vector<8x8xf32> to vector<8x8xbf16>
      %c0_117 = arith.constant 0 : index
      %c0_118 = arith.constant 0 : index
      %c16 = arith.constant 16 : index
      %185 = vector.load %arg6[%c0_117, %c0_118, %c16] : memref<1x8x32xbf16, #tpu.memory_space<vmem>>, vector<1x8x8xbf16>
      %186 = vector.shape_cast %185 : vector<1x8x8xbf16> to vector<8x8xbf16>
      %187 = vector.shape_cast %184 : vector<8x8xbf16> to vector<1x8x8xbf16>
      tpu.vector_store %arg6[%c0_117, %c0_118, %c16], %187 {strides = array<i32>} : memref<1x8x32xbf16, #tpu.memory_space<vmem>>, vector<1x8x8xbf16>,
      %c3_119 = arith.constant 3 : index
      %c0_120 = arith.constant 0 : index
      %c0_121 = arith.constant 0 : index
      %188 = vector.load %arg9[%c3_119, %c0_120, %c0_121] : memref<4x8x1xf32, #tpu.memory_space<vmem>>, vector<1x8x1xf32>
      %189 = vector.shape_cast %188 : vector<1x8x1xf32> to vector<8x1xf32>
      %190 = tpu.reciprocal %189 {approx = true} : vector<8x1xf32> -> vector<8x1xf32>
      %c3_122 = arith.constant 3 : index
      %c0_123 = arith.constant 0 : index
      %c0_124 = arith.constant 0 : index
      %191 = vector.load %arg10[%c3_122, %c0_123, %c0_124] : memref<4x8x8xf32, #tpu.memory_space<vmem>>, vector<1x8x8xf32>
      %192 = vector.shape_cast %191 : vector<1x8x8xf32> to vector<8x8xf32>
      %193 = vector.broadcast %190 : vector<8x1xf32> to vector<8x8xf32>
      %194 = arith.mulf %192, %193 : vector<8x8xf32>
      %195 = arith.truncf %194 : vector<8x8xf32> to vector<8x8xbf16>
      %c0_125 = arith.constant 0 : index
      %c0_126 = arith.constant 0 : index
      %c24 = arith.constant 24 : index
      %196 = vector.load %arg6[%c0_125, %c0_126, %c24] : memref<1x8x32xbf16, #tpu.memory_space<vmem>>, vector<1x8x8xbf16>
      %197 = vector.shape_cast %196 : vector<1x8x8xbf16> to vector<8x8xbf16>
      %198 = vector.shape_cast %195 : vector<8x8xbf16> to vector<1x8x8xbf16>
      tpu.vector_store %arg6[%c0_125, %c0_126, %c24], %198 {strides = array<i32>} : memref<1x8x32xbf16, #tpu.memory_space<vmem>>, vector<1x8x8xbf16>,
    } else {
    }
    return
  }
  func.func @transform_0(%arg0: i32, %arg1: i32, %arg2: i32) -> (i32, i32, i32) {
    %c0_i32 = arith.constant 0 : i32
    %c0_i32_0 = arith.constant 0 : i32
    return %arg0, %arg1, %c0_i32 : i32, i32, i32
  }
  func.func @transform_1(%arg0: i32, %arg1: i32, %arg2: i32) -> (i32, i32, i32) {
    %c0_i32 = arith.constant 0 : i32
    %c0_i32_0 = arith.constant 0 : i32
    return %arg0, %arg2, %c0_i32 : i32, i32, i32
  }
  func.func @transform_2(%arg0: i32, %arg1: i32, %arg2: i32) -> (i32, i32, i32) {
    %c0_i32 = arith.constant 0 : i32
    %c0_i32_0 = arith.constant 0 : i32
    return %arg0, %arg2, %c0_i32 : i32, i32, i32
  }
  func.func @transform_3(%arg0: i32, %arg1: i32, %arg2: i32) -> (i32, i32, i32) {
    %c0_i32 = arith.constant 0 : i32
    %c0_i32_0 = arith.constant 0 : i32
    return %arg0, %arg1, %c0_i32 : i32, i32, i32
  }
}

module attributes {stable_mosaic.version = 11 : i64} {
  func.func @_matmul_kernel(%arg0: i32, %arg1: i32, %arg2: i32, %arg3: memref<16x32xbf16, #tpu.memory_space<vmem>>, %arg4: memref<32x32xbf16, #tpu.memory_space<vmem>>, %arg5: memref<1x32xf32, #tpu.memory_space<vmem>>, %arg6: memref<16x32xf32, #tpu.memory_space<vmem>>, %arg7: memref<16x32xf32, #tpu.memory_space<vmem>>, %arg8: memref<16x32xf32, #tpu.memory_space<vmem>>) attributes {dimension_semantics = [#tpu.dimension_semantics<parallel>, #tpu.dimension_semantics<parallel>, #tpu.dimension_semantics<arbitrary>], iteration_bounds = array<i64: 1, 1, 1>, scalar_prefetch = 0 : i64, scratch_operands = 1 : i64, tpu.core_type = #tpu.core_type<tc>, window_params = [{transform_indices = @transform_0, window_bounds = array<i64: 16, 32>}, {transform_indices = @transform_1, window_bounds = array<i64: 32, 32>}, {transform_indices = @transform_2, window_bounds = array<i64: 1, 32>}, {transform_indices = @transform_3, window_bounds = array<i64: 16, 32>}, {transform_indices = @transform_4, window_bounds = array<i64: 16, 32>}]} {
    %c0_i32 = arith.constant 0 : i32
    %0 = arith.cmpi eq, %arg2, %c0_i32 : i32
    %1 = arith.extui %0 : i1 to i32
    %c0_i32_0 = arith.constant 0 : i32
    %2 = arith.cmpi ne, %1, %c0_i32_0 : i32
    scf.if %2 {
      %cst_10 = arith.constant 0.000000e+00 : f32
      %12 = vector.broadcast %cst_10 : f32 to vector<16x32xf32>
      %c0_11 = arith.constant 0 : index
      %c0_12 = arith.constant 0 : index
      %13 = vector.load %arg8[%c0_11, %c0_12] : memref<16x32xf32, #tpu.memory_space<vmem>>, vector<16x32xf32>
      tpu.vector_store %arg8[%c0_11, %c0_12], %12 {strides = array<i32>} : memref<16x32xf32, #tpu.memory_space<vmem>>, vector<16x32xf32>,
    } else {
    }
    %c0 = arith.constant 0 : index
    %c0_1 = arith.constant 0 : index
    %3 = vector.load %arg8[%c0, %c0_1] : memref<16x32xf32, #tpu.memory_space<vmem>>, vector<16x32xf32>
    %c0_2 = arith.constant 0 : index
    %c0_3 = arith.constant 0 : index
    %4 = vector.load %arg3[%c0_2, %c0_3] : memref<16x32xbf16, #tpu.memory_space<vmem>>, vector<16x32xbf16>
    %c0_4 = arith.constant 0 : index
    %c0_5 = arith.constant 0 : index
    %5 = vector.load %arg4[%c0_4, %c0_5] : memref<32x32xbf16, #tpu.memory_space<vmem>>, vector<32x32xbf16>
    %cst = arith.constant dense<0.000000e+00> : vector<16x32xf32>
    %6 = tpu.matmul %4, %5, %cst {dimension_numbers = #tpu.dot_dimension_numbers<[1], [0], [0], [1], [0, 0, 1, 1], [], []>} : vector<16x32xbf16>, vector<32x32xbf16>, vector<16x32xf32> -> vector<16x32xf32>
    %7 = arith.addf %3, %6 : vector<16x32xf32>
    %c0_6 = arith.constant 0 : index
    %c0_7 = arith.constant 0 : index
    %8 = vector.load %arg8[%c0_6, %c0_7] : memref<16x32xf32, #tpu.memory_space<vmem>>, vector<16x32xf32>
    tpu.vector_store %arg8[%c0_6, %c0_7], %7 {strides = array<i32>} : memref<16x32xf32, #tpu.memory_space<vmem>>, vector<16x32xf32>,
    %c0_i32_8 = arith.constant 0 : i32
    %9 = arith.cmpi eq, %arg2, %c0_i32_8 : i32
    %10 = arith.extui %9 : i1 to i32
    %c0_i32_9 = arith.constant 0 : i32
    %11 = arith.cmpi ne, %10, %c0_i32_9 : i32
    scf.if %11 {
      %c0_10 = arith.constant 0 : index
      %c0_11 = arith.constant 0 : index
      %12 = vector.load %arg8[%c0_10, %c0_11] : memref<16x32xf32, #tpu.memory_space<vmem>>, vector<16x32xf32>
      %c0_12 = arith.constant 0 : index
      %c0_13 = arith.constant 0 : index
      %13 = vector.load %arg5[%c0_12, %c0_13] : memref<1x32xf32, #tpu.memory_space<vmem>>, vector<1x32xf32>
      %14 = vector.broadcast %13 : vector<1x32xf32> to vector<16x32xf32>
      %15 = arith.addf %12, %14 : vector<16x32xf32>
      %c0_14 = arith.constant 0 : index
      %c0_15 = arith.constant 0 : index
      %16 = vector.load %arg6[%c0_14, %c0_15] : memref<16x32xf32, #tpu.memory_space<vmem>>, vector<16x32xf32>
      %17 = arith.addf %15, %16 : vector<16x32xf32>
      %c0_16 = arith.constant 0 : index
      %c0_17 = arith.constant 0 : index
      %18 = vector.load %arg7[%c0_16, %c0_17] : memref<16x32xf32, #tpu.memory_space<vmem>>, vector<16x32xf32>
      tpu.vector_store %arg7[%c0_16, %c0_17], %17 {strides = array<i32>} : memref<16x32xf32, #tpu.memory_space<vmem>>, vector<16x32xf32>,
    } else {
    }
    return
  }
  func.func @transform_0(%arg0: i32, %arg1: i32, %arg2: i32) -> (i32, i32) {
    %c0_i32 = arith.constant 0 : i32
    return %arg0, %arg2 : i32, i32
  }
  func.func @transform_1(%arg0: i32, %arg1: i32, %arg2: i32) -> (i32, i32) {
    %c0_i32 = arith.constant 0 : i32
    return %arg2, %arg1 : i32, i32
  }
  func.func @transform_2(%arg0: i32, %arg1: i32, %arg2: i32) -> (i32, i32) {
    %c0_i32 = arith.constant 0 : i32
    %c0_i32_0 = arith.constant 0 : i32
    return %c0_i32, %arg1 : i32, i32
  }
  func.func @transform_3(%arg0: i32, %arg1: i32, %arg2: i32) -> (i32, i32) {
    %c0_i32 = arith.constant 0 : i32
    return %arg0, %arg1 : i32, i32
  }
  func.func @transform_4(%arg0: i32, %arg1: i32, %arg2: i32) -> (i32, i32) {
    %c0_i32 = arith.constant 0 : i32
    return %arg0, %arg1 : i32, i32
  }
}

module attributes {stable_mosaic.version = 11 : i64} {
  func.func @_add_layernorm_kernel(%arg0: i32, %arg1: memref<16x32xf32, #tpu.memory_space<vmem>>, %arg2: memref<16x32xf32, #tpu.memory_space<vmem>>, %arg3: memref<1x32xf32, #tpu.memory_space<vmem>>, %arg4: memref<1x32xf32, #tpu.memory_space<vmem>>, %arg5: memref<16x32xf32, #tpu.memory_space<vmem>>) attributes {dimension_semantics = [#tpu.dimension_semantics<parallel>], iteration_bounds = array<i64: 1>, scalar_prefetch = 0 : i64, scratch_operands = 0 : i64, tpu.core_type = #tpu.core_type<tc>, window_params = [{transform_indices = @transform_0, window_bounds = array<i64: 16, 32>}, {transform_indices = @transform_1, window_bounds = array<i64: 16, 32>}, {pipeline_mode = #tpu.pipeline_mode<synchronous>, transform_indices = @transform_2, window_bounds = array<i64: 1, 32>}, {pipeline_mode = #tpu.pipeline_mode<synchronous>, transform_indices = @transform_3, window_bounds = array<i64: 1, 32>}, {transform_indices = @transform_4, window_bounds = array<i64: 16, 32>}]} {
    %c0 = arith.constant 0 : index
    %c0_0 = arith.constant 0 : index
    %0 = vector.load %arg1[%c0, %c0_0] : memref<16x32xf32, #tpu.memory_space<vmem>>, vector<16x32xf32>
    %c0_1 = arith.constant 0 : index
    %c0_2 = arith.constant 0 : index
    %1 = vector.load %arg2[%c0_1, %c0_2] : memref<16x32xf32, #tpu.memory_space<vmem>>, vector<16x32xf32>
    %2 = arith.addf %0, %1 : vector<16x32xf32>
    %c0_3 = arith.constant 0 : index
    %c0_4 = arith.constant 0 : index
    %3 = vector.load %arg3[%c0_3, %c0_4] : memref<1x32xf32, #tpu.memory_space<vmem>>, vector<1x32xf32>
    %c0_5 = arith.constant 0 : index
    %c0_6 = arith.constant 0 : index
    %4 = vector.load %arg4[%c0_5, %c0_6] : memref<1x32xf32, #tpu.memory_space<vmem>>, vector<1x32xf32>
    %cst = arith.constant dense<0.000000e+00> : vector<16xf32>
    %5 = vector.multi_reduction <add>, %2, %cst [1] : vector<16x32xf32> to vector<16xf32>
    %6 = vector.shape_cast %5 : vector<16xf32> to vector<16x1xf32>
    %cst_7 = arith.constant 3.200000e+01 : f32
    %7 = vector.broadcast %cst_7 : f32 to vector<16x1xf32>
    %8 = arith.divf %6, %7 : vector<16x1xf32>
    %9 = vector.broadcast %8 : vector<16x1xf32> to vector<16x32xf32>
    %10 = arith.subf %2, %9 : vector<16x32xf32>
    %11 = arith.mulf %10, %10 : vector<16x32xf32>
    %cst_8 = arith.constant dense<0.000000e+00> : vector<16xf32>
    %12 = vector.multi_reduction <add>, %11, %cst_8 [1] : vector<16x32xf32> to vector<16xf32>
    %13 = vector.shape_cast %12 : vector<16xf32> to vector<16x1xf32>
    %cst_9 = arith.constant 3.200000e+01 : f32
    %14 = vector.broadcast %cst_9 : f32 to vector<16x1xf32>
    %15 = arith.divf %13, %14 : vector<16x1xf32>
    %cst_10 = arith.constant 9.99999974E-6 : f32
    %16 = vector.broadcast %cst_10 : f32 to vector<16x1xf32>
    %17 = arith.addf %15, %16 : vector<16x1xf32>
    %18 = math.rsqrt %17 : vector<16x1xf32>
    %19 = vector.broadcast %18 : vector<16x1xf32> to vector<16x32xf32>
    %20 = arith.mulf %10, %19 : vector<16x32xf32>
    %21 = vector.broadcast %3 : vector<1x32xf32> to vector<16x32xf32>
    %22 = arith.mulf %20, %21 : vector<16x32xf32>
    %23 = vector.broadcast %4 : vector<1x32xf32> to vector<16x32xf32>
    %24 = arith.addf %22, %23 : vector<16x32xf32>
    %c0_11 = arith.constant 0 : index
    %c0_12 = arith.constant 0 : index
    %25 = vector.load %arg5[%c0_11, %c0_12] : memref<16x32xf32, #tpu.memory_space<vmem>>, vector<16x32xf32>
    tpu.vector_store %arg5[%c0_11, %c0_12], %24 {strides = array<i32>} : memref<16x32xf32, #tpu.memory_space<vmem>>, vector<16x32xf32>,
    return
  }
  func.func @transform_0(%arg0: i32) -> (i32, i32) {
    %c0_i32 = arith.constant 0 : i32
    %c0_i32_0 = arith.constant 0 : i32
    return %arg0, %c0_i32 : i32, i32
  }
  func.func @transform_1(%arg0: i32) -> (i32, i32) {
    %c0_i32 = arith.constant 0 : i32
    %c0_i32_0 = arith.constant 0 : i32
    return %arg0, %c0_i32 : i32, i32
  }
  func.func @transform_2(%arg0: i32) -> (i32, i32) {
    %c0_i32 = arith.constant 0 : i32
    %c0_i32_0 = arith.constant 0 : i32
    %c0_i32_1 = arith.constant 0 : i32
    return %c0_i32, %c0_i32_0 : i32, i32
  }
  func.func @transform_3(%arg0: i32) -> (i32, i32) {
    %c0_i32 = arith.constant 0 : i32
    %c0_i32_0 = arith.constant 0 : i32
    %c0_i32_1 = arith.constant 0 : i32
    return %c0_i32, %c0_i32_0 : i32, i32
  }
  func.func @transform_4(%arg0: i32) -> (i32, i32) {
    %c0_i32 = arith.constant 0 : i32
    %c0_i32_0 = arith.constant 0 : i32
    return %arg0, %c0_i32 : i32, i32
  }
}

</mosaic_0001>

<bundles_post_ra>
// kernel: whisper_subbed_forward.7
= control target key start
LH: loop header
LB: loop body
LE: loop exit
PB: predicated region body
PF: predicated region fallthrough
CT: control target
= control target key end

     0   :  { %s731_s15 = smov 0   ;;  %s733_s16 = smov 0   ;;  %s798_s0 = inlined_call_operand.vmem [shape: f32[2,8,96], index: 0, kind: input, shape index: {}]   ;;  %s799_s1 = inlined_call_operand.vmem [shape: bf16[96,32], index: 1, kind: input, shape index: {}]   ;;  %s800_s2 = inlined_call_operand.vmem [shape: f32[1,32], index: 2, kind: input, shape index: {}]   ;;  %s801_s3 = inlined_call_operand.vmem [shape: f32[8,32], index: 3, kind: input, shape index: {}]   ;;  %s802_s4 = inlined_call_operand.vmem [shape: f32[2,8,32], index: 4, kind: output, shape index: {}]  }
   0x1   :  { %s735_s17 = smov 0  }
   0x2 LB: > { %s40_s18 = sadd.s32 1, %s698_s16  ;;  %p610_p0 = scmp.ge.s32.totalorder %s702_s17, 1  ;;  %s702_s17 = sphi %s735_s17, %s14_s17   ;;  %s698_s16 = sphi %s733_s16, %s804_s16   ;;  %s694_s15 = sphi %s731_s15, %s803_s15  }
   0x3   : > { %p42_p1 = scmp.ge.s32.totalorder %s40_s18, 2  ;;  %p239_p2 = scmp.lt.s32.totalorder %s702_s17, 3 }
   0x5   : > { %s806_s18 = smov (%p42_p1, %s40_s18), 0  ;;  %p240_p3 = pnand %p610_p0, %p239_p2 }
   0x6   : > { %p293_p4 = scmp.lt.s32.totalorder (!%p240_p3), %s694_s15, 1 }
   0x7   : > { %243 = sbr.rel (%p240_p3) target bundleno = 275 (0x113), region = 36 }
   0xc   : > { %v672_v0 = vld [vmem:[%s799_s1 + $0x28] sm:$0xff]   ;;  %v704_v1 = vmov 0.0   ;;  %v673_v2 = vld [vmem:[%s799_s1 + $0x20] sm:$0xff]   ;;  %vm705_vm0 = vmmov 0   ;;  %vm337_vm1 = vcmask 261120   ;;  %v674_v3 = vld [vmem:[%s799_s1 + $0x18] sm:$0xff]  }
   0xd   : > { %630 = vmatprep.subr.bf16.mxu0 %v704_v1  ;;  %642 = vmatprep.mubr.msk.bf16.mxu0 %vm705_vm0, %v704_v1  ;;  %338 = vst.msk [vmem:[#allocation2] sm:$0xff] %vm337_vm1, %v704_v1  ;;  %s808_s15 = smov (!%p293_p4, %s694_s15), 1  ;;  %v675_v4 = vld [vmem:[%s799_s1 + $0x10] sm:$0xff]   ;;  %v676_v5 = vld [vmem:[%s799_s1 + $0x8] sm:$0xff]   ;;  %v677_v6 = vld [vmem:[%s799_s1] sm:$0xff]   ;;  %vm390_vm2 = vcmask 785408  }
   0xe   : > { %631 = vmatpush3.bf16.msra.mxu0 %v672_v0  ;;  %s611_s27 = sshll.u32 %s808_s15, 3  ;;  %v620_v15 = vld [vmem:[%s800_s2] ss:$0 sm:$0xff] }
   0xf   : > { %632 = vmatprep.subr.bf16.mxu0 %v704_v1  ;;  %s302_s6 = scalar_lea.vmem %s798_s0, %s611_s27  ;;  %v458_v26 = vld [vmem:[%s801_s3] sm:$0xff]  ;;  %s331_s19 = scalar_lea.vmem %s802_s4, %s611_s27 }
  0x10   : > { %v340_v7 = vld [vmem:[%s302_s6] sm:$0xff] }
  0x11   : > { %v341_v8 = vpack.c.bf16 %v340_v7, %v340_v7 }
  0x12   : > { %633 = vmatpush3.bf16.msra.mxu0 %v673_v2 }
  0x13   : > { %634 = vmatprep.subr.bf16.mxu0 %v704_v1 }
  0x14   : > { %v339_v9 = vld [vmem:[#allocation2] sm:$0xff] }
  0x16   : > { %635 = vmatpush3.bf16.msra.mxu0 %v674_v3 }
  0x17   : > { %636 = vmatprep.subr.bf16.mxu0 %v704_v1 }
  0x1a   : > { %637 = vmatpush3.bf16.msra.mxu0 %v675_v4 }
  0x1b   : > { %638 = vmatprep.subr.bf16.mxu0 %v704_v1 }
  0x1e   : > { %639 = vmatpush3.bf16.msra.mxu0 %v676_v5 }
  0x1f   : > { %640 = vmatprep.subr.bf16.mxu0 %v704_v1 }
  0x22   : > { %641 = vmatpush3.bf16.msra.mxu0 %v677_v6 }
  0x25   : > { %643 = vmatmul.mubr.msk.bf16.vlgmr.msra.gmra.mxu0 %vm390_vm2, %v341_v8 }
  0xe5   : > { %v428_v10 = vpop.f32.mrf.mxu0 }
  0xe6   : > { %v434_v11 = vadd.f32 %v428_v10, %v339_v9 }
  0xe7   : > { %v644_v12 = vpop.f32.mrf.mxu0 }
  0xe8   : > { %436 = vst.msk [vmem:[#allocation2] sm:$0xff] %vm337_vm1, %v434_v11 }
  0xe9   : > { %v431_v13 = vpop.f32.mrf.mxu0 }
  0xeb   : > { %v645_v14 = vpop.f32.mrf.mxu0 }
  0xef   : > { %v440_v16 = vld [vmem:[#allocation2] sm:$0xff] }
  0xf0   : > { %v448_v17 = vadd.f32 %v620_v15, %v440_v16 }
  0xf2   : > { %v449_v18 = vmul.f32 %v448_v17, %v448_v17 }
  0xf4   : > { %v450_v19 = vmul.f32 %v449_v18, %v448_v17 }
  0xf6   : > { %v451_v20 = vmul.f32 0.044715, %v450_v19 }
  0xf8   : > { %v452_v21 = vadd.f32 %v451_v20, %v448_v17 }
  0xfa   : > { %v453_v22 = vmul.f32 0.7978846, %v452_v21 }
  0xfc   : > { %678 = vtanh.f32 %v453_v22 }
 0x109   : > { %v679_v23 = vpop.eup %678 }
 0x10a   : > { %v455_v24 = vadd.f32 1.0, %v679_v23 }
 0x10c   : > { %v456_v25 = vmul.f32 0.5, %v455_v24 }
 0x10e   : > { %v457_v27 = vmul.f32 %v456_v25, %v448_v17 }
 0x110   : > { %v459_v28 = vadd.f32 %v458_v26, %v457_v27 }
 0x112   : > { %460 = vst.msk [vmem:[%s331_s19] sm:$0xff] %vm337_vm1, %v459_v28 }
 0x113 PF: > { %s14_s17 = sadd.s32 1, %s702_s17   ;;  %s803_s15 = smov %s698_s16 }
 0x114   : > { %p11_p5 = scmp.ge.s32.totalorder %s14_s17, 4   ;;  %s804_s16 = smov %s806_s18 }
 0x116   :  { %13 = sbr.rel (!%p11_p5) target bundleno = 2 (0x2), region = 83 }

// kernel: whisper_subbed_forward.6
= control target key start
LH: loop header
LB: loop body
LE: loop exit
PB: predicated region body
PF: predicated region fallthrough
CT: control target
= control target key end

     0   :  { %s647_s12 = smov 0   ;;  %s649_s13 = smov 0   ;;  %s702_s0 = inlined_call_operand.vmem [shape: f32[2,16,24], index: 0, kind: input, shape index: {}]   ;;  %s703_s1 = inlined_call_operand.vmem [shape: bf16[24,32], index: 1, kind: input, shape index: {}]   ;;  %s704_s2 = inlined_call_operand.vmem [shape: f32[1,32], index: 2, kind: input, shape index: {}]   ;;  %s705_s3 = inlined_call_operand.vmem [shape: f32[2,16,32], index: 3, kind: output, shape index: {}]  }
   0x1   :  { %s651_s14 = smov 0  }
   0x2 LB: > { %s39_s15 = sadd.s32 1, %s619_s13  ;;  %p545_p0 = scmp.ge.s32.totalorder %s623_s14, 1  ;;  %s623_s14 = sphi %s651_s14, %s13_s14   ;;  %s619_s13 = sphi %s649_s13, %s707_s13   ;;  %s615_s12 = sphi %s647_s12, %s706_s12  }
   0x3   : > { %p41_p1 = scmp.ge.s32.totalorder %s39_s15, 2  ;;  %p203_p2 = scmp.lt.s32.totalorder %s623_s14, 3 }
   0x5   : > { %s709_s15 = smov (%p41_p1, %s39_s15), 0  ;;  %p204_p3 = pnand %p545_p0, %p203_p2 }
   0x6   : > { %p253_p4 = scmp.lt.s32.totalorder (!%p204_p3), %s615_s12, 1 }
   0x7   : > { %207 = sbr.rel (%p204_p3) target bundleno = 261 (0x105), region = 32 }
   0xc   : > { %v595_v0 = vld [vmem:[%s703_s1 + $0x8] ss:$0 sps:$4 sm:$0xff]   ;;  %vm319_vm0 = vcmask 1043456   ;;  %v625_v1 = vmov 0.0   ;;  %vm626_vm1 = vmmov 0   ;;  %vm295_vm2 = vcmask 261120  }
   0xd   : > { %561 = vmatprep.subr.bf16.mxu0 %v625_v1  ;;  %v321_v2 = vsel %vm319_vm0, %v595_v0, 0  ;;  %565 = vmatprep.mubr.msk.bf16.mxu0 %vm626_vm1, %v625_v1  ;;  %v596_v3 = vld [vmem:[%s703_s1] sm:$0xff]   ;;  %296 = vst.msk [vmem:[#allocation2] sm:$0xff] %vm295_vm2, %v625_v1  ;;  %297 = vst.msk [vmem:[#allocation2 + $0x8] sm:$0xff] %vm295_vm2, %v625_v1  ;;  %s711_s12 = smov (!%p253_p4, %s615_s12), 1  ;;  %vm315_vm3 = vcmask 195584  }
   0xe   : > { %562 = vmatpush3.bf16.msra.mxu0 %v321_v2  ;;  %s556_s20 = sshll.u32 %s711_s12, 4  ;;  %v553_v15 = vld [vmem:[%s704_s2] ss:$0 sm:$0xff] }
   0xf   : > { %563 = vmatprep.subr.bf16.mxu0 %v625_v1  ;;  %s263_s23 = scalar_lea.vmem %s702_s0, %s556_s20  ;;  %s288_s28 = scalar_lea.vmem %s705_s3, %s556_s20 }
  0x10   : > { %v300_v4 = vld [vmem:[%s263_s23] sm:$0xff]  ;;  %v301_v5 = vld [vmem:[%s263_s23 + $0x8] sm:$0xff] }
  0x11   : > { %v302_v6 = vpack.c.bf16 %v301_v5, %v300_v4 }
  0x12   : > { %564 = vmatpush3.bf16.msra.mxu0 %v596_v3 }
  0x14   : > { %v298_v7 = vld [vmem:[#allocation2] sm:$0xff]  ;;  %v299_v11 = vld [vmem:[#allocation2 + $0x8] sm:$0xff] }
  0x15   : > { %566 = vmatmul.mubr.msk.bf16.vlgmr.msra.gmra.mxu0 %vm315_vm3, %v302_v6 }
  0xd5   : > { %v357_v8 = vpop.f32.mrf.mxu0 }
  0xd6   : > { %v364_v9 = vadd.f32 %v357_v8, %v298_v7 }
  0xd7   : > { %v567_v10 = vpop.f32.mrf.mxu0 }
  0xd8   : > { %367 = vst.msk [vmem:[#allocation2] sm:$0xff] %vm295_vm2, %v364_v9 }
  0xd9   : > { %v360_v12 = vpop.f32.mrf.mxu0 }
  0xda   : > { %v365_v13 = vadd.f32 %v360_v12, %v299_v11 }
  0xdb   : > { %v568_v14 = vpop.f32.mrf.mxu0 }
  0xdc   : > { %368 = vst.msk [vmem:[#allocation2 + $0x8] sm:$0xff] %vm295_vm2, %v365_v13 }
  0xdf   : > { %v372_v16 = vld [vmem:[#allocation2] sm:$0xff] }
  0xe0   : > { %v381_v17 = vadd.f32 %v553_v15, %v372_v16 }
  0xe2   : > { %v383_v18 = vmul.f32 %v381_v17, %v381_v17 }
  0xe3   : > { %v373_v19 = vld [vmem:[#allocation2 + $0x8] sm:$0xff] }
  0xe4   : > { %v385_v20 = vmul.f32 %v383_v18, %v381_v17  ;;  %v382_v21 = vadd.f32 %v553_v15, %v373_v19 }
  0xe6   : > { %v387_v22 = vmul.f32 0.044715, %v385_v20  ;;  %v384_v23 = vmul.f32 %v382_v21, %v382_v21 }
  0xe8   : > { %v389_v24 = vadd.f32 %v387_v22, %v381_v17  ;;  %v386_v25 = vmul.f32 %v384_v23, %v382_v21 }
  0xea   : > { %v391_v26 = vmul.f32 0.7978846, %v389_v24  ;;  %v388_v27 = vmul.f32 0.044715, %v386_v25 }
  0xec   : > { %597 = vtanh.f32 %v391_v26  ;;  %v390_v28 = vadd.f32 %v388_v27, %v382_v21 }
  0xee   : > { %v392_v29 = vmul.f32 0.7978846, %v390_v28 }
  0xf0   : > { %599 = vtanh.f32 %v392_v29 }
  0xf9   : > { %v598_v30 = vpop.eup %597 }
  0xfa   : > { %v395_v31 = vadd.f32 1.0, %v598_v30 }
  0xfc   : > { %v397_v32 = vmul.f32 0.5, %v395_v31 }
  0xfd   : > { %v600_v33 = vpop.eup %599 }
  0xfe   : > { %v399_v34 = vmul.f32 %v397_v32, %v381_v17  ;;  %v396_v35 = vadd.f32 1.0, %v600_v33 }
 0x100   : > { %401 = vst.msk [vmem:[%s288_s28] sm:$0xff] %vm295_vm2, %v399_v34  ;;  %v398_v36 = vmul.f32 0.5, %v396_v35 }
 0x102   : > { %v400_v37 = vmul.f32 %v398_v36, %v382_v21 }
 0x104   : > { %402 = vst.msk [vmem:[%s288_s28 + $0x8] sm:$0xff] %vm295_vm2, %v400_v37 }
 0x105 PF: > { %s13_s14 = sadd.s32 1, %s623_s14   ;;  %s706_s12 = smov %s619_s13 }
 0x106   : > { %p10_p5 = scmp.ge.s32.totalorder %s13_s14, 4   ;;  %s707_s13 = smov %s709_s15 }
 0x108   :  { %12 = sbr.rel (!%p10_p5) target bundleno = 2 (0x2), region = 76 }

// kernel: whisper_subbed_forward.8
= control target key start
LH: loop header
LB: loop body
LE: loop exit
PB: predicated region body
PF: predicated region fallthrough
CT: control target
= control target key end

     0   :  { %vm41_vm0 = vcmask 261120   ;;  %v411_v15 = vmov 0.0   ;;  %vm412_vm1 = vmmov 0   ;;  %vm93_vm2 = vcmask 257024   ;;  %s540_s0 = inlined_call_operand.vmem [shape: f32[16,32], index: 0, kind: input, shape index: {}]   ;;  %s541_s3 = inlined_call_operand.vmem [shape: bf16[32,32], index: 3, kind: input, shape index: {}]   ;;  %s542_s4 = inlined_call_operand.vmem [shape: bf16[32,32], index: 4, kind: input, shape index: {}]   ;;  %s543_s5 = inlined_call_operand.vmem [shape: bf16[32,32], index: 5, kind: input, shape index: {}]   ;;  %s544_s1 = inlined_call_operand.vmem [shape: f32[1,32], index: 1, kind: input, shape index: {}]   ;;  %s545_s2 = inlined_call_operand.vmem [shape: f32[1,32], index: 2, kind: input, shape index: {}]   ;;  %s546_s6 = inlined_call_operand.vmem [shape: f32[1,32], index: 6, kind: input, shape index: {}]   ;;  %s547_s9 = inlined_call_operand.vmem [shape: bf16[16,32], index: 9, kind: output, shape index: {1}]   ;;  %s548_s8 = inlined_call_operand.vmem [shape: bf16[16,32], index: 8, kind: output, shape index: {0}]   ;;  %s549_s7 = inlined_call_operand.vmem [shape: f32[1,32], index: 7, kind: input, shape index: {}]   ;;  %s550_s10 = inlined_call_operand.vmem [shape: bf16[16,32], index: 10, kind: output, shape index: {2}]  }
   0x1   :  { %v37_v0 = vld [vmem:[%s540_s0] sm:$0xff]  ;;  %v38_v1 = vld [vmem:[%s540_s0 + $0x8] sm:$0xff]  ;;  %374 = vmatprep.subr.bf16.mxu0 %v411_v15  ;;  %382 = vmatprep.subr.bf16.mxu1 %v411_v15 }
   0x2   :  { %v42_v2 = vsel %vm41_vm0, %v37_v0, 0.0  ;;  %v45_v3 = vsel %vm41_vm0, %v38_v1, 0.0  ;;  %v400_v14 = vld [vmem:[%s541_s3 + $0x8] sm:$0xff]   ;;  %v402_v17 = vld [vmem:[%s541_s3] sm:$0xff]   ;;  %378 = vmatprep.mubr.msk.bf16.mxu0 %vm412_vm1, %v411_v15  ;;  %386 = vmatprep.mubr.msk.bf16.mxu1 %vm412_vm1, %v411_v15 }
   0x3   :  { %43 = vadd.xlane.f32.xlu0 %v42_v2  ;;  %v401_v16 = vld [vmem:[%s542_s4 + $0x8] sm:$0xff]   ;;  %375 = vmatpush3.bf16.msra.mxu0 %v400_v14  ;;  %v403_v18 = vld [vmem:[%s542_s4] sm:$0xff]  }
   0x4   :  { %383 = vmatpush3.bf16.msra.mxu1 %v401_v16  ;;  %376 = vmatprep.subr.bf16.mxu0 %v411_v15  ;;  %v335_v26 = vld [vmem:[%s544_s1] ss:$0 sm:$0xff]  ;;  %v405_v37 = vld [vmem:[%s543_s5 + $0x8] sm:$0xff]  }
   0x5   :  { %384 = vmatprep.subr.bf16.mxu1 %v411_v15  ;;  %v336_v28 = vld [vmem:[%s545_s2] ss:$0 sm:$0xff] }
   0x6   :  { %v406_v39 = vld [vmem:[%s543_s5] sm:$0xff]  }
   0x7   :  { %46 = vadd.xlane.f32.xlu0 %v45_v3  ;;  %377 = vmatpush3.bf16.msra.mxu0 %v402_v17  ;;  %v339_v40 = vld [vmem:[%s546_s6] ss:$0 sm:$0xff] }
   0x8   :  { %385 = vmatpush3.bf16.msra.mxu1 %v403_v18  ;;  %390 = vmatprep.subr.bf16.mxu0 %v411_v15  ;;  %v351_v54 = vld [vmem:[%s549_s7] ss:$0 sm:$0xff] }
  0x8c   :  { %v44_v4 = vpop.xlane.xlu0 %43 }
  0x8d   :  { %v49_v5 = vmul.f32 0.03125, %v44_v4 }
  0x8f   :  { %v51_v6 = vsub.f32 %v37_v0, %v49_v5 }
  0x90   :  { %v47_v7 = vpop.xlane.xlu0 %46 }
  0x91   :  { %v50_v8 = vmul.f32 0.03125, %v47_v7  ;;  %v53_v9 = vmul.f32 %v51_v6, %v51_v6 }
  0x93   :  { %v52_v10 = vsub.f32 %v38_v1, %v50_v8  ;;  %v55_v11 = vsel %vm41_vm0, %v53_v9, 0.0 }
  0x94   :  { %56 = vadd.xlane.f32.xlu1 %v55_v11 }
  0x95   :  { %v54_v12 = vmul.f32 %v52_v10, %v52_v10 }
  0x97   :  { %v58_v13 = vsel %vm41_vm0, %v54_v12, 0.0 }
  0x98   :  { %59 = vadd.xlane.f32.xlu1 %v58_v13 }
 0x11d   :  { %v57_v19 = vpop.xlane.xlu1 %56 }
 0x11e   :  { %v61_v20 = vmul.f32 0.03125, %v57_v19 }
 0x120   :  { %v63_v21 = vadd.f32 1e-05, %v61_v20 }
 0x121   :  { %v60_v22 = vpop.xlane.xlu1 %59 }
 0x122   :  { %407 = vrsqrt.f32 %v63_v21  ;;  %v62_v23 = vmul.f32 0.03125, %v60_v22 }
 0x124   :  { %v64_v24 = vadd.f32 1e-05, %v62_v23 }
 0x126   :  { %409 = vrsqrt.f32 %v64_v24 }
 0x12f   :  { %v408_v25 = vpop.eup %407 }
 0x130   :  { %v67_v27 = vmul.f32 %v408_v25, %v51_v6 }
 0x132   :  { %v75_v29 = vmul.f32 %v335_v26, %v67_v27 }
 0x133   :  { %v410_v30 = vpop.eup %409 }
 0x134   :  { %v83_v31 = vadd.f32 %v336_v28, %v75_v29  ;;  %v68_v32 = vmul.f32 %v410_v30, %v52_v10 }
 0x136   :  { %v357_v33 = vpack.c.bf16 %v83_v31, %v83_v31  ;;  %v76_v34 = vmul.f32 %v335_v26, %v68_v32 }
 0x138   :  { %94 = vst.msk [vmem:[#allocation2] sm:$0xf] %vm93_vm2, %v357_v33  ;;  %v84_v35 = vadd.f32 %v336_v28, %v76_v34 }
 0x13a   :  { %v358_v36 = vpack.c.bf16 %v84_v35, %v84_v35 }
 0x13c   :  { %95 = vst.msk [vmem:[#allocation2 + $0x4] sm:$0xf] %vm93_vm2, %v358_v36 }
 0x143   :  { %v404_v38 = vld [vmem:[#allocation2] sm:$0xff]  }
 0x144   :  { %379 = vmatmul.mubr.msk.bf16.vlgmr.msra.gmra.mxu0 %vm41_vm0, %v404_v38  ;;  %387 = vmatmul.mubr.msk.bf16.vlgmr.msra.gmra.mxu1 %vm41_vm0, %v404_v38 }
 0x145   :  { %391 = vmatpush3.bf16.msra.mxu0 %v405_v37  ;;  %394 = vmatprep.mubr.msk.bf16.mxu0 %vm412_vm1, %v411_v15 }
 0x146   :  { %392 = vmatprep.subr.bf16.mxu0 %v411_v15 }
 0x149   :  { %393 = vmatpush3.bf16.msra.mxu0 %v406_v39 }
 0x14c   :  { %395 = vmatmul.mubr.msk.bf16.vlgmr.msra.gmra.mxu0 %vm41_vm0, %v404_v38 }
 0x204   :  { %v164_v41 = vpop.f32.mrf.mxu0  ;;  %v232_v42 = vpop.f32.mrf.mxu1 }
 0x205   :  { %v165_v43 = vadd.f32 %v339_v40, %v164_v41  ;;  %v361_v44 = vpack.c.bf16 %v232_v42, %v232_v42 }
 0x206   :  { %v380_v45 = vpop.f32.mrf.mxu0  ;;  %v388_v46 = vpop.f32.mrf.mxu1 }
 0x207   :  { %v359_v47 = vpack.c.bf16 %v165_v43, %v165_v43  ;;  %247 = vst.msk [vmem:[%s547_s9] sm:$0xf] %vm93_vm2, %v361_v44 }
 0x208   :  { %v167_v48 = vpop.f32.mrf.mxu0  ;;  %v235_v49 = vpop.f32.mrf.mxu1 }
 0x209   :  { %180 = vst.msk [vmem:[%s548_s8] sm:$0xf] %vm93_vm2, %v359_v47  ;;  %v168_v50 = vadd.f32 %v339_v40, %v167_v48  ;;  %v362_v51 = vpack.c.bf16 %v235_v49, %v235_v49 }
 0x20a   :  { %v381_v52 = vpop.f32.mrf.mxu0  ;;  %v389_v53 = vpop.f32.mrf.mxu1 }
 0x20b   :  { %v360_v55 = vpack.c.bf16 %v168_v50, %v168_v50  ;;  %248 = vst.msk [vmem:[%s547_s9 + $0x4] sm:$0xf] %vm93_vm2, %v362_v51 }
 0x20c   :  { %v306_v56 = vpop.f32.mrf.mxu0 }
 0x20d   :  { %181 = vst.msk [vmem:[%s548_s8 + $0x4] sm:$0xf] %vm93_vm2, %v360_v55  ;;  %v307_v57 = vadd.f32 %v351_v54, %v306_v56 }
 0x20e   :  { %v396_v58 = vpop.f32.mrf.mxu0 }
 0x20f   :  { %v363_v59 = vpack.c.bf16 %v307_v57, %v307_v57 }
 0x210   :  { %v309_v60 = vpop.f32.mrf.mxu0 }
 0x211   :  { %321 = vst.msk [vmem:[%s550_s10] sm:$0xf] %vm93_vm2, %v363_v59  ;;  %v310_v61 = vadd.f32 %v351_v54, %v309_v60 }
 0x212   :  { %v397_v62 = vpop.f32.mrf.mxu0 }
 0x213   :  { %v364_v63 = vpack.c.bf16 %v310_v61, %v310_v61 }
 0x215   :  { %322 = vst.msk [vmem:[%s550_s10 + $0x4] sm:$0xf] %vm93_vm2, %v364_v63 }

// kernel: whisper_subbed_forward.9
= control target key start
LH: loop header
LB: loop body
LE: loop exit
PB: predicated region body
PF: predicated region fallthrough
CT: control target
= control target key end

     0   :  { %s1215_s12 = smov 0   ;;  %s1217_s13 = smov 0   ;;  %s1374_s0 = inlined_call_operand.vmem [shape: bf16[2,8,32], index: 0, kind: input, shape index: {}]   ;;  %s1375_s1 = inlined_call_operand.vmem [shape: bf16[2,8,32], index: 1, kind: input, shape index: {}]   ;;  %s1376_s2 = inlined_call_operand.vmem [shape: bf16[2,8,32], index: 2, kind: input, shape index: {}]   ;;  %s1377_s3 = inlined_call_operand.vmem [shape: bf16[2,8,32], index: 3, kind: output, shape index: {}]  }
   0x1   :  { %s1219_s14 = smov 0  }
   0x2 LB: > { %s32_s15 = sadd.s32 1, %s1179_s13  ;;  %p1011_p0 = scmp.ge.s32.totalorder %s1183_s14, 1  ;;  %s1183_s14 = sphi %s1219_s14, %s13_s14   ;;  %s1179_s13 = sphi %s1217_s13, %s1379_s13   ;;  %s1175_s12 = sphi %s1215_s12, %s1378_s12  }
   0x3   : > { %p34_p1 = scmp.ge.s32.totalorder %s32_s15, 2  ;;  %p190_p2 = scmp.lt.s32.totalorder %s1183_s14, 3 }
   0x5   : > { %s1381_s15 = smov (%p34_p1, %s32_s15), 0  ;;  %p191_p3 = pnand %p1011_p0, %p190_p2 }
   0x6   : > { %p232_p4 = scmp.lt.s32.totalorder (!%p191_p3), %s1175_s12, 1  ;;  %s1189_s23 = smov (!%p191_p3), 120  }
   0x7   : > { %194 = sbr.rel (%p191_p3) target bundleno = 1415 (0x587), region = 32  ;;  %s1190_s24 = smov (!%p191_p3), 112  }
   0x8   : > { %s1191_s25 = smov (!%p191_p3), 104   ;;  %s1192_s29 = smov (!%p191_p3), 8  }
   0x9   : > { %s1193_s6 = smov (!%p191_p3), 16   ;;  %s1194_s7 = smov (!%p191_p3), 24  }
   0xc   : > { %vm280_vm0 = vcmask 64512   ;;  %v1185_v0 = vmov 0.0   ;;  %vm1186_vm1 = vmmov 0   ;;  %s1383_s12 = smov (!%p232_p4, %s1175_s12), 1  ;;  %vm269_vm2 = vcmask 257024  }
   0xd   : > { %1051 = vmatprep.subr.bf16.mxu0 %v1185_v0  ;;  %281 = vst.msk [vmem:[#allocation5] sm:$0xff] %vm280_vm0, %v1185_v0  ;;  %282 = vst.msk [vmem:[#allocation5 + $0x8] sm:$0xff] %vm280_vm0, %v1185_v0  ;;  %1053 = vmatprep.mubr.msk.bf16.mxu0 %vm1186_vm1, %v1185_v0  ;;  %s1247_s16 = sshll.u32 %s1383_s12, 2  ;;  %vm271_vm3 = vcmask 7168   ;;  %v1187_v8 = vmov -inf   ;;  %v1188_v14 = vmov 0  }
   0xe   : > { %283 = vst.msk [vmem:[#allocation5 + $0x10] sm:$0xff] %vm280_vm0, %v1185_v0  ;;  %284 = vst.msk [vmem:[#allocation5 + $0x18] sm:$0xff] %vm280_vm0, %v1185_v0  ;;  %1057 = vmatprep.subr.bf16.mxu1 %v1185_v0  ;;  %1059 = vmatprep.mubr.msk.bf16.mxu1 %vm1186_vm1, %v1185_v0  ;;  %s238_s19 = scalar_lea.vmem %s1374_s0, %s1247_s16  ;;  %s245_s22 = scalar_lea.vmem %s1375_s1, %s1247_s16  ;;  %vm363_vm4 = vcmask 1043456   ;;  %vm844_vm5 = vcmask 60416   ;;  %vm862_vm6 = vcmask 126016   ;;  %vm880_vm7 = vcmask 191616  }
   0xf   : > { %v265_v1 = vld [vmem:[%s238_s19] sm:$0xf]  ;;  %272 = vst.msk [vmem:[#allocation3] sm:$0xff] %vm271_vm3, %v1187_v8  ;;  %273 = vst.msk [vmem:[#allocation3 + $0x8] sm:$0xff] %vm271_vm3, %v1187_v8  ;;  %1133 = vset.pattern.permute.xlu0 %v1188_v14  ;;  %1134 = vset.pattern.permute.xlu1 %v1188_v14  ;;  %s252_s28 = scalar_lea.vmem %s1376_s2, %s1247_s16  ;;  %s259_s5 = scalar_lea.vmem %s1377_s3, %s1247_s16  ;;  %vm898_vm8 = vcmask 257216  }
  0x10   : > { %v286_v2 = vld [vmem:[%s245_s22] sm:$0xf]  ;;  %v266_v3 = vunpack.c.l.bf16 %v265_v1  ;;  %274 = vst.msk [vmem:[#allocation3 + $0x10] sm:$0xff] %vm271_vm3, %v1187_v8  ;;  %275 = vst.msk [vmem:[#allocation3 + $0x18] sm:$0xff] %vm271_vm3, %v1187_v8 }
  0x11   : > { %v293_v4 = vsel %vm280_vm0, %v286_v2, 0  ;;  %276 = vst.msk [vmem:[#allocation4] sm:$0xff] %vm271_vm3, %v1185_v0  ;;  %277 = vst.msk [vmem:[#allocation4 + $0x8] sm:$0xff] %vm271_vm3, %v1185_v0  ;;  %v1019_v15 = vcombine.low %v286_v2, %v286_v2  ;;  %v1295_v21 = vld [vmem:[%s252_s28] sm:$0xf] }
  0x12   : > { %1052 = vmatpush3.bf16.xpose.msra.mxu0 %v293_v4  ;;  %v267_v5 = vmul.f32 0.35355338, %v266_v3  ;;  %278 = vst.msk [vmem:[#allocation4 + $0x10] sm:$0xff] %vm271_vm3, %v1185_v0  ;;  %279 = vst.msk [vmem:[#allocation4 + $0x18] sm:$0xff] %vm271_vm3, %v1185_v0  ;;  %v365_v22 = vsel %vm363_vm4, %v1295_v21, 0  ;;  %v1021_v4 = vcombine.low %v1295_v21, %v1295_v21 }
  0x13   : > { %1069 = vmatprep.subr.bf16.mxu0 %v1185_v0  ;;  %425 = vrot.lane.b32.xlu1 %v1019_v15, %s1189_s23 }
  0x14   : > { %v268_v6 = vpack.c.bf16 %v267_v5, %v267_v5  ;;  %1058 = vmatpush3.bf16.msra.mxu1 %v365_v22 }
  0x15   : > { %1063 = vmatprep.subr.bf16.mxu1 %v1185_v0 }
  0x16   : > { %270 = vst.msk [vmem:[#allocation2] sm:$0xf] %vm269_vm2, %v268_v6  ;;  %v1281_v17 = vld [vmem:[#allocation3] sm:$0xff]  ;;  %v474_v56 = vld [vmem:[#allocation3 + $0x8] sm:$0xff] }
  0x17   : > { %v612_v60 = vld [vmem:[#allocation3 + $0x10] sm:$0xff]  ;;  %v747_v1 = vld [vmem:[#allocation3 + $0x18] sm:$0xff] }
  0x1d   : > { %v285_v7 = vld [vmem:[#allocation2] sm:$0xf] }
  0x1e   : > { %1054 = vmatmul.mubr.msk.bf16.vlgmr.msra.gmra.mxu0 %vm280_vm0, %v285_v7  ;;  %v1018_v16 = vcombine.low %v285_v7, %v285_v7 }
  0x1f   : > { %1071 = vmatprep.mubr.msk.bf16.mxu0 %vm1186_vm1, %v1185_v0 }
  0x20   : > { %420 = vrot.lane.b32.xlu1 %v1018_v16, %s1189_s23 }
  0x24   : > { %563 = vrot.lane.b32.xlu1 %v1019_v15, %s1190_s24 }
  0x28   : > { %561 = vrot.lane.b32.xlu1 %v1018_v16, %s1190_s24 }
  0x2c   : > { %698 = vrot.lane.b32.xlu1 %v1019_v15, %s1191_s25 }
  0x30   : > { %696 = vrot.lane.b32.xlu1 %v1018_v16, %s1191_s25 }
  0x85   : > { %v426_v26 = vpop.permute.xlu1 %425 }
  0x86   : > { %v431_v29 = vsel %vm280_vm0, %v426_v26, 0 }
  0x92   : > { %v421_v27 = vpop.permute.xlu1 %420 }
  0x96   : > { %v564_v31 = vpop.permute.xlu1 %563 }
  0x97   : > { %v569_v33 = vsel %vm280_vm0, %v564_v31, 0 }
  0x9a   : > { %v562_v32 = vpop.permute.xlu1 %561 }
  0x9e   : > { %v699_v34 = vpop.permute.xlu1 %698 }
  0x9f   : > { %v704_v35 = vsel %vm280_vm0, %v699_v34, 0 }
  0xa2   : > { %v697_v36 = vpop.permute.xlu1 %696 }
  0xde   : > { %v329_v9 = vpop.f32.mrf.mxu0 }
  0xdf   : > { %v336_v10 = vsel %vm280_vm0, %v329_v9, -inf }
  0xe0   : > { %337 = vmax.xlane.f32.xlu0 %v336_v10  ;;  %v1055_v11 = vpop.f32.mrf.mxu0 }
  0xe2   : > { %v332_v12 = vpop.f32.mrf.mxu0 }
  0xe4   : > { %v1056_v13 = vpop.f32.mrf.mxu0 }
 0x169   : > { %v338_v18 = vpop.xlane.xlu0 %337 }
 0x16a   : > { %v1284_v19 = vmax.f32 %v1281_v17, %v338_v18 }
 0x16c   : > { %v340_v20 = vsub.f32 %v1281_v17, %v1284_v19  ;;  %416 = vst.msk [vmem:[#allocation3] sm:$0xff] %vm271_vm3, %v1284_v19  ;;  %345 = vperm.xlu0 %1133, %v1284_v19  }
 0x1e7   : > { %v346_v23 = vpop.permute.xlu0 %345 }
 0x1e8   : > { %v348_v24 = vsub.f32 %v329_v9, %v346_v23 }
 0x1ea   : > { %v349_v25 = vmul.f32 1.442695, %v348_v24 }
 0x1ec   : > { %1137 = vpow2.f32 %v349_v25 }
 0x1f9   : > { %v1300_v28 = vpop.eup %1137 }
 0x1fa   : > { %v359_v30 = vpack.c.bf16 %v1300_v28, %v1300_v28  ;;  %v353_v23 = vsel %vm280_vm0, %v1300_v28, 0.0 }
 0x1fc   : > { %1060 = vmatmul.mubr.msk.bf16.vlgmr.msra.gmra.mxu1 %vm280_vm0, %v359_v30 }
 0x1fd   : > { %1064 = vmatpush3.bf16.xpose.msra.mxu1 %v431_v29  ;;  %1065 = vmatprep.mubr.msk.bf16.mxu1 %vm1186_vm1, %v1185_v0 }
 0x1fe   : > { %1075 = vmatprep.subr.bf16.mxu1 %v1185_v0 }
 0x204   : > { %1066 = vmatmul.mubr.msk.bf16.vlgmr.msra.gmra.mxu1 %vm280_vm0, %v421_v27 }
 0x205   : > { %1076 = vmatpush3.bf16.xpose.msra.mxu1 %v569_v33  ;;  %1077 = vmatprep.mubr.msk.bf16.mxu1 %vm1186_vm1, %v1185_v0 }
 0x206   : > { %1087 = vmatprep.subr.bf16.mxu1 %v1185_v0 }
 0x20c   : > { %1078 = vmatmul.mubr.msk.bf16.vlgmr.msra.gmra.mxu1 %vm280_vm0, %v562_v32 }
 0x20d   : > { %1088 = vmatpush3.bf16.xpose.msra.mxu1 %v704_v35  ;;  %1089 = vmatprep.mubr.msk.bf16.mxu1 %vm1186_vm1, %v1185_v0 }
 0x214   : > { %1090 = vmatmul.mubr.msk.bf16.vlgmr.msra.gmra.mxu1 %vm280_vm0, %v697_v36 }
 0x2bc   : > { %v1319_v37 = vpop.f32.mrf.mxu1 }
 0x2be   : > { %v1061_v38 = vpop.f32.mrf.mxu1 }
 0x2bf   : > { %v341_v38 = vmul.f32 1.442695, %v340_v20  ;;  %v629_v20 = vld [vmem:[#allocation4 + $0x10] sm:$0xff] }
 0x2c0   : > { %v404_v39 = vpop.f32.mrf.mxu1 }
 0x2c2   : > { %v1062_v40 = vpop.f32.mrf.mxu1 }
 0x2c4   : > { %v467_v41 = vpop.f32.mrf.mxu1 }
 0x2c5   : > { %v475_v42 = vsel %vm280_vm0, %v467_v41, -inf }
 0x2c6   : > { %476 = vmax.xlane.f32.xlu1 %v475_v42  ;;  %v1067_v43 = vpop.f32.mrf.mxu1  ;;  %v491_v42 = vld [vmem:[#allocation4 + $0x8] sm:$0xff] }
 0x2c8   : > { %v470_v44 = vpop.f32.mrf.mxu1 }
 0x2ca   : > { %v1068_v45 = vpop.f32.mrf.mxu1 }
 0x2cb   : > { %v351_v45 = vld [vmem:[#allocation4] sm:$0xff] }
 0x2cc   : > { %v605_v46 = vpop.f32.mrf.mxu1 }
 0x2cd   : > { %v613_v47 = vsel %vm280_vm0, %v605_v46, -inf }
 0x2ce   : > { %614 = vmax.xlane.f32.xlu0 %v613_v47  ;;  %v1079_v48 = vpop.f32.mrf.mxu1 }
 0x2d0   : > { %v608_v49 = vpop.f32.mrf.mxu1 }
 0x2d2   : > { %v1080_v50 = vpop.f32.mrf.mxu1 }
 0x2d4   : > { %v740_v51 = vpop.f32.mrf.mxu1 }
 0x2d5   : > { %v748_v52 = vsel %vm280_vm0, %v740_v51, -inf }
 0x2d6   : > { %749 = vmax.xlane.f32.xlu1 %v748_v52  ;;  %v1091_v53 = vpop.f32.mrf.mxu1  ;;  %v764_v52 = vld [vmem:[#allocation4 + $0x18] sm:$0xff] }
 0x2d8   : > { %v743_v54 = vpop.f32.mrf.mxu1 }
 0x2da   : > { %v1092_v55 = vpop.f32.mrf.mxu1 }
 0x34f   : > { %v477_v57 = vpop.xlane.xlu1 %476 }
 0x350   : > { %v478_v58 = vmax.f32 %v474_v56, %v477_v57 }
 0x352   : > { %v479_v59 = vsub.f32 %v474_v56, %v478_v58  ;;  %560 = vst.msk [vmem:[#allocation3 + $0x8] sm:$0xff] %vm271_vm3, %v478_v58  ;;  %484 = vperm.xlu1 %1134, %v478_v58   ;;  %v407_v58 = vld [vmem:[#allocation5] sm:$0xff] }
 0x354   : > { %v480_v22 = vmul.f32 1.442695, %v479_v59 }
 0x357   : > { %v615_v61 = vpop.xlane.xlu0 %614 }
 0x358   : > { %v616_v62 = vmax.f32 %v612_v60, %v615_v61 }
 0x35a   : > { %v617_v63 = vsub.f32 %v612_v60, %v616_v62  ;;  %695 = vst.msk [vmem:[#allocation3 + $0x10] sm:$0xff] %vm271_vm3, %v616_v62  ;;  %622 = vperm.xlu0 %1133, %v616_v62  }
 0x35c   : > { %v618_v29 = vmul.f32 1.442695, %v617_v63 }
 0x35f   : > { %v750_v2 = vpop.xlane.xlu1 %749 }
 0x360   : > { %v751_v3 = vmax.f32 %v747_v1, %v750_v2 }
 0x362   : > { %v752_v5 = vsub.f32 %v747_v1, %v751_v3  ;;  %830 = vst.msk [vmem:[#allocation3 + $0x18] sm:$0xff] %vm271_vm3, %v751_v3  ;;  %757 = vperm.xlu1 %1134, %v751_v3  }
 0x364   : > { %v753_v40 = vmul.f32 1.442695, %v752_v5 }
 0x366   : > { %502 = vrot.lane.b32.xlu1 %v1021_v4, %s1189_s23 }
 0x36a   : > { %637 = vrot.lane.b32.xlu1 %v1021_v4, %s1190_s24 }
 0x36e   : > { %772 = vrot.lane.b32.xlu1 %v1021_v4, %s1191_s25  ;;  %v551_v4 = vld [vmem:[#allocation5 + $0x8] sm:$0xff] }
 0x3cd   : > { %v485_v6 = vpop.permute.xlu1 %484 }
 0x3ce   : > { %v487_v7 = vsub.f32 %v467_v41, %v485_v6 }
 0x3d0   : > { %v488_v8 = vmul.f32 1.442695, %v487_v7 }
 0x3d2   : > { %1139 = vpow2.f32 %v488_v8 }
 0x3d5   : > { %v623_v9 = vpop.permute.xlu0 %622 }
 0x3d6   : > { %v625_v10 = vsub.f32 %v605_v46, %v623_v9 }
 0x3d8   : > { %v626_v11 = vmul.f32 1.442695, %v625_v10  ;;  %v686_v10 = vld [vmem:[#allocation5 + $0x10] sm:$0xff] }
 0x3da   : > { %1141 = vpow2.f32 %v626_v11 }
 0x3dd   : > { %v758_v12 = vpop.permute.xlu1 %757 }
 0x3de   : > { %v760_v13 = vsub.f32 %v740_v51, %v758_v12 }
 0x3df   : > { %v1140_v14 = vpop.eup %1139 }
 0x3e0   : > { %v761_v15 = vmul.f32 1.442695, %v760_v13  ;;  %v493_v16 = vsel %vm280_vm0, %v1140_v14, 0.0  ;;  %v498_v24 = vpack.c.bf16 %v1140_v14, %v1140_v14 }
 0x3e1   : > { %494 = vadd.xlane.f32.xlu1 %v493_v16  ;;  %v503_v18 = vpop.permute.xlu1 %502 }
 0x3e2   : > { %1143 = vpow2.f32 %v761_v15  ;;  %v508_v21 = vsel %vm363_vm4, %v503_v18, 0  ;;  %v821_v18 = vld [vmem:[#allocation5 + $0x18] sm:$0xff] }
 0x3e3   : > { %1070 = vmatpush3.bf16.msra.mxu0 %v508_v21  ;;  %1145 = vpow2.f32 %v480_v22 }
 0x3e4   : > { %1081 = vmatprep.subr.bf16.mxu0 %v1185_v0  ;;  %1147 = vpow2.f32 %v618_v29 }
 0x3e5   : > { %354 = vadd.xlane.f32.xlu1 %v353_v23  ;;  %v638_v25 = vpop.permute.xlu1 %637  ;;  %1149 = vpow2.f32 %v341_v38 }
 0x3e6   : > { %1072 = vmatmul.mubr.msk.bf16.vlgmr.msra.gmra.mxu0 %vm280_vm0, %v498_v24  ;;  %v643_v26 = vsel %vm363_vm4, %v638_v25, 0  ;;  %1151 = vpow2.f32 %v753_v40 }
 0x3e7   : > { %v1142_v27 = vpop.eup %1141  ;;  %1082 = vmatpush3.bf16.msra.mxu0 %v643_v26  ;;  %1083 = vmatprep.mubr.msk.bf16.mxu0 %vm1186_vm1, %v1185_v0 }
 0x3e8   : > { %v631_v30 = vsel %vm280_vm0, %v1142_v27, 0.0  ;;  %1093 = vmatprep.subr.bf16.mxu0 %v1185_v0  ;;  %v636_v31 = vpack.c.bf16 %v1142_v27, %v1142_v27 }
 0x3e9   : > { %632 = vadd.xlane.f32.xlu0 %v631_v30  ;;  %v773_v28 = vpop.permute.xlu1 %772 }
 0x3ea   : > { %v778_v32 = vsel %vm363_vm4, %v773_v28, 0 }
 0x3ee   : > { %1084 = vmatmul.mubr.msk.bf16.vlgmr.msra.gmra.mxu0 %vm280_vm0, %v636_v31 }
 0x3ef   : > { %v1144_v33 = vpop.eup %1143  ;;  %1094 = vmatpush3.bf16.msra.mxu0 %v778_v32  ;;  %1095 = vmatprep.mubr.msk.bf16.mxu0 %vm1186_vm1, %v1185_v0 }
 0x3f0   : > { %v766_v34 = vsel %vm280_vm0, %v1144_v33, 0.0  ;;  %v771_v35 = vpack.c.bf16 %v1144_v33, %v1144_v33  ;;  %v1146_v36 = vpop.eup %1145 }
 0x3f1   : > { %767 = vadd.xlane.f32.xlu0 %v766_v34  ;;  %v1148_v39 = vpop.eup %1147  ;;  %v492_v43 = vmul.f32 %v1146_v36, %v491_v42 }
 0x3f2   : > { %v1150_v41 = vpop.eup %1149  ;;  %v630_v48 = vmul.f32 %v1148_v39, %v629_v20 }
 0x3f3   : > { %v1152_v0 = vpop.eup %1151  ;;  %v352_v17 = vmul.f32 %v1150_v41, %v351_v45 }
 0x3f4   : > { %v765_v54 = vmul.f32 %v1152_v0, %v764_v52 }
 0x3f6   : > { %1096 = vmatmul.mubr.msk.bf16.vlgmr.msra.gmra.mxu0 %vm280_vm0, %v771_v35  ;;  %554 = vperm.xlu1 %1134, %v1146_v36  }
 0x3fa   : > { %689 = vperm.xlu1 %1134, %v1148_v39  }
 0x407   : > { %410 = vperm.xlu0 %1133, %v1150_v41  }
 0x40b   : > { %824 = vperm.xlu0 %1133, %v1152_v0  }
 0x46a   : > { %v495_v44 = vpop.xlane.xlu1 %494 }
 0x46b   : > { %v496_v46 = vadd.f32 %v495_v44, %v492_v43 }
 0x46d   : > { %497 = vst.msk [vmem:[#allocation4 + $0x8] sm:$0xff] %vm271_vm3, %v496_v46 }
 0x46e   : > { %v355_v19 = vpop.xlane.xlu1 %354 }
 0x46f   : > { %v356_v47 = vadd.f32 %v355_v19, %v352_v17 }
 0x471   : > { %358 = vst.msk [vmem:[#allocation4] sm:$0xff] %vm271_vm3, %v356_v47 }
 0x472   : > { %v633_v49 = vpop.xlane.xlu0 %632  ;;  %v555_v5 = vpop.permute.xlu1 %554 }
 0x473   : > { %v634_v50 = vadd.f32 %v633_v49, %v630_v48  ;;  %v557_v6 = vmul.f32 %v555_v5, %v551_v4 }
 0x474   : > { %v846_v51 = vld [vmem:[#allocation4 + $0x8] sm:$0xff] }
 0x475   : > { %635 = vst.msk [vmem:[#allocation4 + $0x10] sm:$0xff] %vm271_vm3, %v634_v50  ;;  %1153 = vrcp.f32 %v846_v51 }
 0x476   : > { %v690_v11 = vpop.permute.xlu1 %689 }
 0x477   : > { %v692_v13 = vmul.f32 %v690_v11, %v686_v10 }
 0x478   : > { %v834_v53 = vld [vmem:[#allocation4] sm:$0xff] }
 0x479   : > { %1155 = vrcp.f32 %v834_v53 }
 0x47a   : > { %v768_v55 = vpop.xlane.xlu0 %767 }
 0x47b   : > { %v769_v56 = vadd.f32 %v768_v55, %v765_v54 }
 0x47c   : > { %v864_v57 = vld [vmem:[#allocation4 + $0x10] sm:$0xff] }
 0x47d   : > { %770 = vst.msk [vmem:[#allocation4 + $0x18] sm:$0xff] %vm271_vm3, %v769_v56  ;;  %1157 = vrcp.f32 %v864_v57 }
 0x482   : > { %v1154_v59 = vpop.eup %1153  ;;  %v411_v60 = vpop.permute.xlu0 %410 }
 0x483   : > { %v413_v61 = vmul.f32 %v411_v60, %v407_v58  ;;  %851 = vperm.xlu0 %1133, %v1154_v59  }
 0x484   : > { %v882_v62 = vld [vmem:[#allocation4 + $0x18] sm:$0xff] }
 0x485   : > { %v414_v63 = vadd.f32 %v413_v61, %v1319_v37  ;;  %1159 = vrcp.f32 %v882_v62 }
 0x486   : > { %v1156_v1 = vpop.eup %1155  ;;  %v825_v21 = vpop.permute.xlu0 %824 }
 0x487   : > { %415 = vst.msk [vmem:[#allocation5] sm:$0xff] %vm280_vm0, %v414_v63  ;;  %839 = vperm.xlu1 %1134, %v1156_v1   ;;  %v827_v24 = vmul.f32 %v825_v21, %v821_v18 }
 0x48a   : > { %v1158_v2 = vpop.eup %1157 }
 0x48b   : > { %869 = vperm.xlu0 %1133, %v1158_v2  }
 0x48e   : > { %v836_v34 = vld [vmem:[#allocation5] sm:$0xff] }
 0x492   : > { %v1160_v3 = vpop.eup %1159 }
 0x493   : > { %887 = vperm.xlu0 %1133, %v1160_v3  }
 0x4a6   : > { %v544_v7 = vpop.f32.mrf.mxu0 }
 0x4a7   : > { %v558_v8 = vadd.f32 %v557_v6, %v544_v7 }
 0x4a8   : > { %v1073_v9 = vpop.f32.mrf.mxu0 }
 0x4a9   : > { %559 = vst.msk [vmem:[#allocation5 + $0x8] sm:$0xff] %vm280_vm0, %v558_v8 }
 0x4aa   : > { %v547_v37 = vpop.f32.mrf.mxu0 }
 0x4ac   : > { %v1074_v12 = vpop.f32.mrf.mxu0 }
 0x4ae   : > { %v679_v14 = vpop.f32.mrf.mxu0 }
 0x4af   : > { %v693_v15 = vadd.f32 %v692_v13, %v679_v14 }
 0x4b0   : > { %v1085_v16 = vpop.f32.mrf.mxu0  ;;  %v848_v31 = vld [vmem:[#allocation5 + $0x8] sm:$0xff] }
 0x4b1   : > { %694 = vst.msk [vmem:[#allocation5 + $0x10] sm:$0xff] %vm280_vm0, %v693_v15 }
 0x4b2   : > { %v682_v22 = vpop.f32.mrf.mxu0 }
 0x4b4   : > { %v1086_v23 = vpop.f32.mrf.mxu0 }
 0x4b6   : > { %v814_v25 = vpop.f32.mrf.mxu0 }
 0x4b7   : > { %v828_v26 = vadd.f32 %v827_v24, %v814_v25 }
 0x4b8   : > { %v1097_v27 = vpop.f32.mrf.mxu0  ;;  %v866_v40 = vld [vmem:[#allocation5 + $0x10] sm:$0xff] }
 0x4b9   : > { %829 = vst.msk [vmem:[#allocation5 + $0x18] sm:$0xff] %vm280_vm0, %v828_v26 }
 0x4ba   : > { %v817_v29 = vpop.f32.mrf.mxu0 }
 0x4bc   : > { %v1098_v30 = vpop.f32.mrf.mxu0 }
 0x4c0   : > { %v884_v43 = vld [vmem:[#allocation5 + $0x18] sm:$0xff] }
 0x4fe   : > { %v852_v28 = vpop.permute.xlu0 %851 }
 0x4ff   : > { %v854_v32 = vmul.f32 %v852_v28, %v848_v31 }
 0x501   : > { %v1032_v33 = vpack.c.bf16 %v854_v32, %v854_v32 }
 0x502   : > { %v840_v35 = vpop.permute.xlu1 %839 }
 0x503   : > { %v842_v36 = vmul.f32 %v840_v35, %v836_v34  ;;  %859 = vrot.lane.b32.xlu1 %v1032_v33, %s1192_s29 }
 0x505   : > { %v843_v38 = vpack.c.bf16 %v842_v36, %v842_v36 }
 0x506   : > { %v870_v39 = vpop.permute.xlu0 %869 }
 0x507   : > { %845 = vst.msk [vmem:[%s259_s5] sm:$0xf] %vm844_vm5, %v843_v38  ;;  %v872_v41 = vmul.f32 %v870_v39, %v866_v40 }
 0x509   : > { %v1033_v0 = vpack.c.bf16 %v872_v41, %v872_v41 }
 0x50b   : > { %877 = vrot.lane.b32.xlu1 %v1033_v0, %s1193_s6 }
 0x50e   : > { %v888_v42 = vpop.permute.xlu0 %887 }
 0x50f   : > { %v890_v44 = vmul.f32 %v888_v42, %v884_v43 }
 0x511   : > { %v1034_v45 = vpack.c.bf16 %v890_v44, %v890_v44 }
 0x513   : > { %895 = vrot.lane.b32.xlu1 %v1034_v45, %s1194_s7 }
 0x575   : > { %v860_v46 = vpop.permute.xlu1 %859 }
 0x576   : > { %863 = vst.msk [vmem:[%s259_s5] sm:$0xf] %vm862_vm6, %v860_v46 }
 0x57d   : > { %v878_v17 = vpop.permute.xlu1 %877 }
 0x57e   : > { %881 = vst.msk [vmem:[%s259_s5] sm:$0xf] %vm880_vm7, %v878_v17 }
 0x585   : > { %v896_v19 = vpop.permute.xlu1 %895 }
 0x586   : > { %899 = vst.msk [vmem:[%s259_s5] sm:$0xf] %vm898_vm8, %v896_v19 }
 0x587 PF: > { %s13_s14 = sadd.s32 1, %s1183_s14   ;;  %s1378_s12 = smov %s1179_s13 }
 0x588   : > { %p10_p5 = scmp.ge.s32.totalorder %s13_s14, 4   ;;  %s1379_s13 = smov %s1381_s15 }
 0x58a   :  { %12 = sbr.rel (!%p10_p5) target bundleno = 2 (0x2), region = 85 }

// kernel: whisper_subbed_forward.10
= control target key start
LH: loop header
LB: loop body
LE: loop exit
PB: predicated region body
PF: predicated region fallthrough
CT: control target
= control target key end

     0   :  { %vm22_vm0 = vcmask 261120   ;;  %v144_v0 = vmov 0.0   ;;  %vm145_vm1 = vmmov 0   ;;  %s202_s1 = inlined_call_operand.vmem [shape: bf16[32,32], index: 1, kind: input, shape index: {}]   ;;  %s203_s0 = inlined_call_operand.vmem [shape: bf16[16,32], index: 0, kind: input, shape index: {}]   ;;  %s204_s2 = inlined_call_operand.vmem [shape: f32[1,32], index: 2, kind: input, shape index: {}]   ;;  %s205_s3 = inlined_call_operand.vmem [shape: f32[16,32], index: 3, kind: input, shape index: {}]   ;;  %s206_s4 = inlined_call_operand.vmem [shape: f32[16,32], index: 4, kind: output, shape index: {}]  }
   0x1   :  { %131 = vmatprep.subr.bf16.mxu0 %v144_v0  ;;  %v141_v1 = vld [vmem:[%s202_s1 + $0x8] sm:$0xff]   ;;  %135 = vmatprep.mubr.msk.bf16.mxu0 %vm145_vm1, %v144_v0  ;;  %23 = vst.msk [vmem:[#allocation2] sm:$0xff] %vm22_vm0, %v144_v0  ;;  %24 = vst.msk [vmem:[#allocation2 + $0x8] sm:$0xff] %vm22_vm0, %v144_v0  ;;  %v142_v2 = vld [vmem:[%s202_s1] sm:$0xff]  }
   0x2   :  { %132 = vmatpush3.bf16.msra.mxu0 %v141_v1  ;;  %v143_v3 = vld [vmem:[%s203_s0] sm:$0xff]   ;;  %v114_v18 = vld [vmem:[%s205_s3 + $0x8] sm:$0xff] }
   0x3   :  { %133 = vmatprep.subr.bf16.mxu0 %v144_v0  ;;  %v127_v12 = vld [vmem:[%s204_s2] ss:$0 sm:$0xff] }
   0x4   :  { %v113_v14 = vld [vmem:[%s205_s3] sm:$0xff] }
   0x6   :  { %134 = vmatpush3.bf16.msra.mxu0 %v142_v2 }
   0x8   :  { %v25_v4 = vld [vmem:[#allocation2] sm:$0xff]  ;;  %v26_v8 = vld [vmem:[#allocation2 + $0x8] sm:$0xff] }
   0x9   :  { %136 = vmatmul.mubr.msk.bf16.vlgmr.msra.gmra.mxu0 %vm22_vm0, %v143_v3 }
  0xc9   :  { %v88_v5 = vpop.f32.mrf.mxu0 }
  0xca   :  { %v95_v6 = vadd.f32 %v88_v5, %v25_v4 }
  0xcb   :  { %v137_v7 = vpop.f32.mrf.mxu0 }
  0xcc   :  { %97 = vst.msk [vmem:[#allocation2] sm:$0xff] %vm22_vm0, %v95_v6 }
  0xcd   :  { %v91_v9 = vpop.f32.mrf.mxu0 }
  0xce   :  { %v96_v10 = vadd.f32 %v91_v9, %v26_v8 }
  0xcf   :  { %v138_v11 = vpop.f32.mrf.mxu0 }
  0xd0   :  { %98 = vst.msk [vmem:[#allocation2 + $0x8] sm:$0xff] %vm22_vm0, %v96_v10 }
  0xd3   :  { %v102_v13 = vld [vmem:[#allocation2] sm:$0xff] }
  0xd4   :  { %v111_v15 = vadd.f32 %v127_v12, %v102_v13 }
  0xd6   :  { %v115_v16 = vadd.f32 %v113_v14, %v111_v15 }
  0xd7   :  { %v103_v17 = vld [vmem:[#allocation2 + $0x8] sm:$0xff] }
  0xd8   :  { %117 = vst.msk [vmem:[%s206_s4] sm:$0xff] %vm22_vm0, %v115_v16  ;;  %v112_v19 = vadd.f32 %v127_v12, %v103_v17 }
  0xda   :  { %v116_v20 = vadd.f32 %v114_v18, %v112_v19 }
  0xdc   :  { %118 = vst.msk [vmem:[%s206_s4 + $0x8] sm:$0xff] %vm22_vm0, %v116_v20 }

// kernel: whisper_subbed_forward.11
= control target key start
LH: loop header
LB: loop body
LE: loop exit
PB: predicated region body
PF: predicated region fallthrough
CT: control target
= control target key end

     0   :  { %vm26_vm0 = vcmask 261120   ;;  %s174_s0 = inlined_call_operand.vmem [shape: f32[16,32], index: 0, kind: input, shape index: {}]   ;;  %s175_s1 = inlined_call_operand.vmem [shape: f32[16,32], index: 1, kind: input, shape index: {}]   ;;  %s176_s2 = inlined_call_operand.vmem [shape: f32[1,32], index: 2, kind: input, shape index: {}]   ;;  %s177_s3 = inlined_call_operand.vmem [shape: f32[1,32], index: 3, kind: input, shape index: {}]   ;;  %s178_s4 = inlined_call_operand.hbm [shape: f32[16,32], index: 4, kind: output, shape index: {}]  }
   0x1   :  { %v18_v0 = vld [vmem:[%s174_s0] sm:$0xff]  ;;  %v19_v2 = vld [vmem:[%s174_s0 + $0x8] sm:$0xff] }
   0x2   :  { %v20_v1 = vld [vmem:[%s175_s1] sm:$0xff]  ;;  %v21_v4 = vld [vmem:[%s175_s1 + $0x8] sm:$0xff] }
   0x3   :  { %v22_v3 = vadd.f32 %v20_v1, %v18_v0 }
   0x4   :  { %9 = vsyncpa [#allocation3], 0  ;;  %v23_v5 = vadd.f32 %v21_v4, %v19_v2  ;;  %v88_v25 = vld [vmem:[%s176_s2] ss:$0 sm:$0xff]  ;;  %s119_s25 = smov [#allocation2]  }
   0x5   :  { %v27_v6 = vsel %vm26_vm0, %v22_v3, 0.0  ;;  %v89_v27 = vld [vmem:[%s177_s3] ss:$0 sm:$0xff]  ;;  %s77_s26 = sshll.u32 %s119_s25, 4  ;;  %s78_s26 = int_to_ptr.vmem [resolvable:$true] %s77_s26 }
   0x6   :  { %28 = vadd.xlane.f32.xlu0 %v27_v6  ;;  %v30_v7 = vsel %vm26_vm0, %v23_v5, 0.0  ;;  %s97_s27 = scalar_lea.vmem %s78_s26, 256  ;;  %p102_p1 = scmp.lt.s32.totalorder %s78_s26, %s78_s26 }
   0x7   :  { %p98_p0 = scmp.ne.s32.totalorder %s78_s26, %s97_s27  ;;  %p103_p2 = scmp.lt.s32.totalorder %s97_s27, %s97_s27 }
   0x9   :  { %p104_p3 = por %p103_p2, %p102_p1 }
   0xa   :  { %31 = vadd.xlane.f32.xlu0 %v30_v7 }
   0xb   :  { %p105_p4 = pnand %p104_p3, %p98_p0 }
  0x8f   :  { %v29_v8 = vpop.xlane.xlu0 %28 }
  0x90   :  { %v34_v9 = vmul.f32 0.03125, %v29_v8 }
  0x92   :  { %v36_v10 = vsub.f32 %v22_v3, %v34_v9 }
  0x93   :  { %v32_v11 = vpop.xlane.xlu0 %31 }
  0x94   :  { %v35_v12 = vmul.f32 0.03125, %v32_v11  ;;  %v38_v13 = vmul.f32 %v36_v10, %v36_v10 }
  0x96   :  { %v37_v14 = vsub.f32 %v23_v5, %v35_v12  ;;  %v40_v15 = vsel %vm26_vm0, %v38_v13, 0.0 }
  0x97   :  { %41 = vadd.xlane.f32.xlu1 %v40_v15 }
  0x98   :  { %v39_v16 = vmul.f32 %v37_v14, %v37_v14 }
  0x9a   :  { %v43_v17 = vsel %vm26_vm0, %v39_v16, 0.0 }
  0x9b   :  { %44 = vadd.xlane.f32.xlu1 %v43_v17 }
 0x120   :  { %v42_v18 = vpop.xlane.xlu1 %41 }
 0x121   :  { %v46_v19 = vmul.f32 0.03125, %v42_v18 }
 0x123   :  { %v48_v20 = vadd.f32 1e-05, %v46_v19 }
 0x124   :  { %v45_v21 = vpop.xlane.xlu1 %44 }
 0x125   :  { %93 = vrsqrt.f32 %v48_v20  ;;  %v47_v22 = vmul.f32 0.03125, %v45_v21 }
 0x127   :  { %v49_v23 = vadd.f32 1e-05, %v47_v22 }
 0x129   :  { %95 = vrsqrt.f32 %v49_v23 }
 0x132   :  { %v94_v24 = vpop.eup %93 }
 0x133   :  { %v52_v26 = vmul.f32 %v94_v24, %v36_v10 }
 0x135   :  { %v60_v28 = vmul.f32 %v88_v25, %v52_v26 }
 0x136   :  { %v96_v29 = vpop.eup %95 }
 0x137   :  { %v53_v30 = vmul.f32 %v96_v29, %v37_v14  ;;  %v68_v31 = vadd.f32 %v89_v27, %v60_v28 }
 0x139   :  { %v61_v32 = vmul.f32 %v88_v25, %v53_v30  ;;  %70 = vst.msk [vmem:[#allocation2] sm:$0xff] %vm26_vm0, %v68_v31 }
 0x13b   :  { %v69_v33 = vadd.f32 %v89_v27, %v61_v32 }
 0x13d   :  { %71 = vst.msk [vmem:[#allocation2 + $0x8] sm:$0xff] %vm26_vm0, %v69_v33 }
 0x13e   :  { %108 = shalt.err (!%p105_p4)
}
 0x13f   :  { %s120_s2 = smov 128   ;;  %s121_s3 = smov 8  }
 0x140   :  { %83 = dma.vmem_to_hbm [thread:$0]  %s78_s26, 256, %s178_s4, [#allocation3], %s120_s2, %s120_s2, %s121_s3  }
 0x141   :  { %117 = dma.done.wait [#allocation3], 256  }
 0x142   :  { %118 = vsyncadd [#allocation3], 4294967040 }
 0x143   :  { %87 = vsyncpa [#allocation3], 1 }

</bundles_post_ra>
